<compile_context>
chip_gen: v6e
topology: v6e:2x2x1
jax: 0.10.0
libtpu: 0.0.40
codegen_flags: <defaults>
</compile_context>

<pallas_src>
import functools

import jax
import jax.numpy as jnp
import numpy as np
from jax import lax
from jax.experimental import pallas as pl
from jax.experimental.pallas import tpu as pltpu


def _sigmoid(x):
    return 1.0 / (1.0 + jnp.exp(-x))


# ----------------------------- Pallas kernel --------------------------------


def _decoder_kernel(
    # batch-blocked state / activations
    logits0_ref, hidden0_ref, cell0_ref, prevc0_ref, enc_ref, eproj_ref,
    # weights (constant index maps -> DMA'd into VMEM once per batch block)
    emb_ref, w_ah_ref, b_a_ref, v_a_ref,
    wii_e_ref, wii_c_ref, wii_p_ref, b_ifo_ref,
    wih_ref, wic_ref, whh_ref, b_hh_ref,
    wir_e_ref, wir_c_ref, wir_p_ref,
    wo_h_ref, wo_c_ref, wo_e_ref, b_o_ref,
    # packed per-step output [T, Bb, D_pad]
    out_ref,
    *, approx_recip,
):
    f32 = jnp.float32
    Bb, V = logits0_ref.shape
    Hd = hidden0_ref.shape[1]
    _, L, C = enc_ref.shape
    T, _, D_pad = out_ref.shape
    Dout = V + 2 * Hd + C
    npad = D_pad - Dout
    mxu = emb_ref.dtype                    # bf16 on v6e/v7x, f32 otherwise
    cast = lambda x: x.astype(mxu)         # MXU inputs only; elementwise stays f32

    def step(t, carry):
        logits, hidden, cx0, prev_c = carry

        # ---- torch.topk(input, 1)[1] + embedding lookup (one-hot MXU gather)
        mx = jnp.max(logits, axis=-1, keepdims=True)
        iota = lax.broadcasted_iota(jnp.int32, (Bb, V), 1)
        idx = jnp.min(jnp.where(logits == mx, iota, V), axis=-1, keepdims=True)
        onehot = (iota == idx).astype(mxu)
        embedded = jnp.dot(onehot, emb_ref[...],
                           preferred_element_type=f32)                  # [Bb,E]

        # ---- additive attention (e_proj hoisted; scores lane-dense [Bb,L])
        h_proj = jnp.dot(cast(hidden), w_ah_ref[...],
                         preferred_element_type=f32)                    # [Bb,Hd]
        energy = jnp.tanh(eproj_ref[...] + h_proj[:, None, :]
                          + b_a_ref[...][None])                         # [Bb,L,Hd]
        score = jnp.sum(energy * v_a_ref[...][None], axis=-1)           # [Bb,L]
        score = score - jnp.max(score, axis=-1, keepdims=True)
        p = jnp.exp(score)
        denom = jnp.sum(p, axis=-1, keepdims=True)
        if approx_recip:
            a = p * pl.reciprocal(denom, approx=True)   # EUP slot, ~free
        else:
            a = p / denom
        # Weighted context on the MXU (batched matvec), not the VPU/XLU.
        ctx = jnp.einsum("bql,blc->bqc", cast(a)[:, None, :], enc_ref[...],
                         preferred_element_type=f32)[:, 0, :]           # [Bb,C]

        # ---- ResLSTM input-side projections: K-split dots (no lane concats)
        emb_c, ctx_c, pc_c = cast(embedded), cast(ctx), cast(prev_c)
        x_ifo = (jnp.dot(emb_c, wii_e_ref[...], preferred_element_type=f32)
                 + jnp.dot(ctx_c, wii_c_ref[...], preferred_element_type=f32)
                 + jnp.dot(pc_c, wii_p_ref[...], preferred_element_type=f32)
                 + b_ifo_ref[...])                                      # [Bb,3Hd]
        xr = (jnp.dot(emb_c, wir_e_ref[...], preferred_element_type=f32)
              + jnp.dot(ctx_c, wir_c_ref[...], preferred_element_type=f32)
              + jnp.dot(pc_c, wir_p_ref[...], preferred_element_type=f32))

        def cell_step(hx, cx):
            hx_c, cx_c = cast(hx), cast(cx)
            ifo = (x_ifo
                   + jnp.dot(hx_c, wih_ref[...], preferred_element_type=f32)
                   + jnp.dot(cx_c, wic_ref[...], preferred_element_type=f32))
            i_g = _sigmoid(ifo[:, :Hd])
            f_g = _sigmoid(ifo[:, Hd:2 * Hd])
            o_g = _sigmoid(ifo[:, 2 * Hd:])
            g = jnp.tanh(jnp.dot(hx_c, whh_ref[...],
                                 preferred_element_type=f32) + b_hh_ref[...])
            cy = f_g * cx + i_g * g
            hy = o_g * (jnp.tanh(cy) + xr)
            return hy, cy

        h1, c1 = cell_step(hidden, cx0)     # first rnn() call
        # TODO(synk): nn.Dropout(p=0.5) on (h1, c1) is identity (eval mode).
        h2, c2 = cell_step(h1, c1)          # second rnn() call (same rnn_input)

        # ---- fc_out(cat(output, c, embedded)) as K-split dots
        pred = (jnp.dot(cast(h2), wo_h_ref[...], preferred_element_type=f32)
                + jnp.dot(ctx_c, wo_c_ref[...], preferred_element_type=f32)
                + jnp.dot(emb_c, wo_e_ref[...], preferred_element_type=f32)
                + b_o_ref[...])                                         # [Bb,V]

        # ---- single lane-dense packed store: [pred | hidden | cell | ctx | 0pad]
        pieces = [pred, h2, c2, ctx]
        if npad:
            pieces.append(jnp.zeros((Bb, npad), f32))
        out_ref[t] = jnp.concatenate(pieces, axis=-1)

        # greedy feedback to the next decode step
        return (pred, h2, c2, ctx)

    init = (logits0_ref[...], hidden0_ref[...], cell0_ref[...], prevc0_ref[...])
    lax.fori_loop(0, T, step, init, unroll=(T <= 8))


# ------------------------------- wrappers ------------------------------------


def _pad_rows(x, n):
    d = n - x.shape[0]
    if d == 0:
        return x
    return jnp.pad(x, ((0, d),) + ((0, 0),) * (x.ndim - 1))


def decoder_decode(logits0, hidden0, cell0, encoder_outputs, prev_c0, params, T,
                   *, compute_dtype=jnp.float32, b_block=8, approx_recip=False):
    """Fused T-step greedy decode (single pallas_call, in-kernel decode loop).

    encoder_outputs is [L, B, 2*He] (PyTorch layout).  Each step is exactly
    Decoder.forward (eval mode); input / hidden / cell / prev_c are fed back
    inside the kernel.  Returns per-step (pred, hidden, cell, c) stacked on
    axis 0.  compute_dtype=bfloat16 enables the bf16-MXU path (v6e/v7x)."""
    f32 = jnp.float32
    B, V = logits0.shape
    Hd = hidden0.shape[1]
    C = prev_c0.shape[1]                           # 2 * enc_hid_dim
    L = encoder_outputs.shape[0]
    E = params["emb"].shape[1]
    Dout = V + 2 * Hd + C
    D_pad = ((Dout + 127) // 128) * 128            # lane-dense packed output
    b_block = max(8, ((b_block + 7) // 8) * 8)     # sublane-dense batch blocks
    B_pad = ((B + b_block - 1) // b_block) * b_block
    nb = B_pad // b_block

    cd = compute_dtype
    w_attn = params["w_attn"]
    w_ah, w_ae = w_attn[:Hd], w_attn[Hd:]
    wii, wir, wo = params["wii"], params["wir"], params["wo"]

    # One-time layout / projection glue, amortized over all T steps.
    enc_blc = _pad_rows(jnp.transpose(encoder_outputs, (1, 0, 2)), B_pad)  # [Bp,L,C]
    eproj = jnp.einsum("blc,ch->blh", enc_blc, w_ae,
                       preferred_element_type=f32).astype(f32)            # [Bp,L,Hd]
    b_ifo = (params["b_ii"] + params["b_ih"] + params["b_ic"]).astype(f32)

    state = tuple(_pad_rows(x.astype(f32), B_pad)
                  for x in (logits0, hidden0, cell0, prev_c0))

    weights = (
        params["emb"].astype(cd), w_ah.astype(cd),
        params["b_a"].astype(f32), params["v_a"].astype(f32),
        wii[:E].astype(cd), wii[E:E + C].astype(cd), wii[E + C:].astype(cd),
        b_ifo,
        params["wih"].astype(cd), params["wic"].astype(cd),
        params["whh"].astype(cd), params["b_hh"].astype(f32),
        wir[:E].astype(cd), wir[E:E + C].astype(cd), wir[E + C:].astype(cd),
        wo[:Hd].astype(cd), wo[Hd:Hd + C].astype(cd), wo[Hd + C:].astype(cd),
        params["b_o"].astype(f32),
    )
    ins = state + (enc_blc.astype(cd), eproj) + weights

    def blocked(x):                      # batch-blocked inputs
        shp = (b_block,) + x.shape[1:]
        nd = x.ndim
        return pl.BlockSpec(shp, lambda i, _nd=nd: (i,) + (0,) * (_nd - 1))

    def resident(x):                     # weights: constant index map
        nd = x.ndim
        return pl.BlockSpec(x.shape, lambda i, _nd=nd: (0,) * _nd)

    in_specs = [blocked(x) for x in ins[:6]] + [resident(x) for x in ins[6:]]

    grid_spec = pltpu.PrefetchScalarGridSpec(
        num_scalar_prefetch=0,
        grid=(nb,),                      # independent batch blocks
        in_specs=in_specs,
        out_specs=pl.BlockSpec((T, b_block, D_pad), lambda i: (0, i, 0)),
        scratch_shapes=[],
    )

    packed = pl.pallas_call(
        functools.partial(_decoder_kernel, approx_recip=approx_recip),
        out_shape=jax.ShapeDtypeStruct((T, B_pad, D_pad), f32),
        grid_spec=grid_spec,
        compiler_params=pltpu.CompilerParams(
            dimension_semantics=("parallel",),       # 2nd TensorCore on v7x
            vmem_limit_bytes=32 * 1024 * 1024),
    )(*ins)

    pred = packed[:, :B, :V]
    hid = packed[:, :B, V:V + Hd]
    cel = packed[:, :B, V + Hd:V + 2 * Hd]
    ctx = packed[:, :B, V + 2 * Hd:Dout]
    return pred, hid, cel, ctx


def decoder_forward(logits, hidden, cell, encoder_outputs, prev_c, params,
                    *, compute_dtype=jnp.float32, approx_recip=False):
    """Single-step forward, identical semantics to the PyTorch module."""
    pred, h, c, ctx = decoder_decode(
        logits, hidden, cell, encoder_outputs, prev_c, params, T=1,
        compute_dtype=compute_dtype, approx_recip=approx_recip)
    return pred[0], h[0], c[0], ctx[0]


# --------------------------- pure-JAX reference ------------------------------


def decoder_ref_step(logits, hidden, cell, enc_blc, prev_c, params):
    Hd = hidden.shape[1]
    idx = jnp.argmax(logits, axis=-1)
    embedded = params["emb"][idx]                              # [B, E]

    w_ah = params["w_attn"][:Hd]
    w_ae = params["w_attn"][Hd:]
    h_proj = hidden @ w_ah
    e_proj = jnp.einsum("blc,ch->blh", enc_blc, w_ae)
    energy = jnp.tanh(h_proj[:, None, :] + e_proj + params["b_a"][None])
    score = jnp.sum(energy * params["v_a"][None], axis=-1)     # [B, L]
    a = jax.nn.softmax(score, axis=-1)
    ctx = jnp.einsum("bl,blc->bc", a, enc_blc)

    x_cat = jnp.concatenate([embedded, ctx, prev_c], axis=-1)

    def cell_step(hx, cx):
        ifo = (x_cat @ params["wii"] + params["b_ii"]
               + hx @ params["wih"] + params["b_ih"]
               + cx @ params["wic"] + params["b_ic"])
        i_g = jax.nn.sigmoid(ifo[:, :Hd])
        f_g = jax.nn.sigmoid(ifo[:, Hd:2 * Hd])
        o_g = jax.nn.sigmoid(ifo[:, 2 * Hd:])
        g = jnp.tanh(hx @ params["whh"] + params["b_hh"])
        cy = f_g * cx + i_g * g
        xr = x_cat @ params["wir"]
        hy = o_g * (jnp.tanh(cy) + xr)
        return hy, cy

    h1, c1 = cell_step(hidden, cell)
    h2, c2 = cell_step(h1, c1)
    pred = (jnp.concatenate([h2, ctx, embedded], axis=-1) @ params["wo"]
            + params["b_o"])
    return pred, h2, c2, ctx


def decoder_ref(logits, hidden, cell, encoder_outputs, prev_c, params):
    enc_blc = jnp.transpose(encoder_outputs, (1, 0, 2))
    return decoder_ref_step(logits, hidden, cell, enc_blc, prev_c, params)


def decoder_ref_decode(logits, hidden, cell, encoder_outputs, prev_c, params, T):
    enc_blc = jnp.transpose(encoder_outputs, (1, 0, 2))
    preds, hs, cs, ctxs = [], [], [], []
    for _ in range(T):
        pred, hidden, cell, ctx = decoder_ref_step(
            logits, hidden, cell, enc_blc, prev_c, params)
        preds.append(pred); hs.append(hidden); cs.append(cell); ctxs.append(ctx)
        logits, prev_c = pred, ctx
    return (jnp.stack(preds), jnp.stack(hs), jnp.stack(cs), jnp.stack(ctxs))


# ------------------------------- parameters ----------------------------------


def init_params(key, V, E, He, Hd):
    C = 2 * He
    Din = E + C + C                    # rnn input: cat(embedded, c, prev_c)
    Dfc = Hd + C + E                   # fc_out input: cat(output, c, embedded)
    keys = jax.random.split(key, 16)

    def w(k, shape):
        return jax.random.normal(k, shape, jnp.float32) * 0.1

    return dict(
        emb=w(keys[0], (V, E)),
        w_attn=w(keys[1], (Hd + C, Hd)),
        b_a=w(keys[2], (1, Hd)),
        v_a=w(keys[3], (1, Hd)),
        wii=w(keys[4], (Din, 3 * Hd)),
        b_ii=w(keys[5], (1, 3 * Hd)),
        wih=w(keys[6], (Hd, 3 * Hd)),
        b_ih=w(keys[7], (1, 3 * Hd)),
        wic=w(keys[8], (Hd, 3 * Hd)),
        b_ic=w(keys[9], (1, 3 * Hd)),
        whh=w(keys[10], (Hd, Hd)),
        b_hh=w(keys[11], (1, Hd)),
        wir=w(keys[12], (Din, Hd)),
        wo=w(keys[13], (Dfc, V)),
        b_o=w(keys[14], (1, V)),
    )


# ---------------------------------- main --------------------------------------


if __name__ == "__main__":
    # batch, vocab, emb, enc_hid, dec_hid, src_len, decode steps
    B, V, E, He, Hd, L, T = 4, 16, 8, 8, 16, 8, 6
    C = 2 * He

    key = jax.random.PRNGKey(0)
    k0, k1, k2, k3, k4, k5 = jax.random.split(key, 6)

    logits = jax.random.normal(k0, (B, V), jnp.float32)
    hidden = jax.random.normal(k1, (B, Hd), jnp.float32)
    cell = jax.random.normal(k2, (B, Hd), jnp.float32)
    encoder_outputs = jax.random.normal(k3, (L, B, C), jnp.float32)
    prev_c = jax.random.normal(k4, (B, C), jnp.float32)
    params = init_params(k5, V, E, He, Hd)

    # 1) single-step forward (f32) == the PyTorch module's forward
    outs = jax.block_until_ready(
        decoder_forward(logits, hidden, cell, encoder_outputs, prev_c, params))
    refs = decoder_ref(logits, hidden, cell, encoder_outputs, prev_c, params)
    for g, r in zip(outs, refs):
        np.testing.assert_allclose(np.asarray(g), np.asarray(r),
                                   atol=2e-3, rtol=2e-3)

    # 2) fused T-step greedy decode (one grid step, in-kernel fori_loop)
    outs = jax.block_until_ready(
        decoder_decode(logits, hidden, cell, encoder_outputs, prev_c, params, T))
    refs = decoder_ref_decode(
        logits, hidden, cell, encoder_outputs, prev_c, params, T)
    for g, r in zip(outs, refs):
        np.testing.assert_allclose(np.asarray(g), np.asarray(r),
                                   atol=2e-3, rtol=2e-3)

    # 3) bf16 MXU-input path (v6e/v7x) + approx EUP softmax reciprocal,
    #    single step, loose tolerance vs the f32 reference.
    outs = jax.block_until_ready(
        decoder_forward(logits, hidden, cell, encoder_outputs, prev_c, params,
                        compute_dtype=jnp.bfloat16, approx_recip=True))
    for g, r in zip(outs, refs0 := decoder_ref(
            logits, hidden, cell, encoder_outputs, prev_c, params)):
        np.testing.assert_allclose(np.asarray(g), np.asarray(r),
                                   atol=1e-1, rtol=1e-1)

    print("KERNEL_OK")
</pallas_src>

<mosaic_0001>
module attributes {stable_mosaic.version = 11 : i64} {
  func.func @_decoder_kernel(%arg0: i32, %arg1: memref<8x16xf32, #tpu.memory_space<vmem>>, %arg2: memref<8x16xf32, #tpu.memory_space<vmem>>, %arg3: memref<8x16xf32, #tpu.memory_space<vmem>>, %arg4: memref<8x16xf32, #tpu.memory_space<vmem>>, %arg5: memref<8x8x16xf32, #tpu.memory_space<vmem>>, %arg6: memref<8x8x16xf32, #tpu.memory_space<vmem>>, %arg7: memref<16x8xf32, #tpu.memory_space<vmem>>, %arg8: memref<16x16xf32, #tpu.memory_space<vmem>>, %arg9: memref<1x16xf32, #tpu.memory_space<vmem>>, %arg10: memref<1x16xf32, #tpu.memory_space<vmem>>, %arg11: memref<8x48xf32, #tpu.memory_space<vmem>>, %arg12: memref<16x48xf32, #tpu.memory_space<vmem>>, %arg13: memref<16x48xf32, #tpu.memory_space<vmem>>, %arg14: memref<1x48xf32, #tpu.memory_space<vmem>>, %arg15: memref<16x48xf32, #tpu.memory_space<vmem>>, %arg16: memref<16x48xf32, #tpu.memory_space<vmem>>, %arg17: memref<16x16xf32, #tpu.memory_space<vmem>>, %arg18: memref<1x16xf32, #tpu.memory_space<vmem>>, %arg19: memref<8x16xf32, #tpu.memory_space<vmem>>, %arg20: memref<16x16xf32, #tpu.memory_space<vmem>>, %arg21: memref<16x16xf32, #tpu.memory_space<vmem>>, %arg22: memref<16x16xf32, #tpu.memory_space<vmem>>, %arg23: memref<16x16xf32, #tpu.memory_space<vmem>>, %arg24: memref<8x16xf32, #tpu.memory_space<vmem>>, %arg25: memref<1x16xf32, #tpu.memory_space<vmem>>, %arg26: memref<1x8x128xf32, #tpu.memory_space<vmem>>) attributes {dimension_semantics = [#tpu.dimension_semantics<parallel>], iteration_bounds = array<i64: 1>, scalar_prefetch = 0 : i64, scratch_operands = 0 : i64, tpu.core_type = #tpu.core_type<tc>, window_params = [{transform_indices = @transform_0, window_bounds = array<i64: 8, 16>}, {transform_indices = @transform_1, window_bounds = array<i64: 8, 16>}, {transform_indices = @transform_2, window_bounds = array<i64: 8, 16>}, {transform_indices = @transform_3, window_bounds = array<i64: 8, 16>}, {transform_indices = @transform_4, window_bounds = array<i64: 8, 8, 16>}, {transform_indices = @transform_5, window_bounds = array<i64: 8, 8, 16>}, {pipeline_mode = #tpu.pipeline_mode<synchronous>, transform_indices = @transform_6, window_bounds = array<i64: 16, 8>}, {pipeline_mode = #tpu.pipeline_mode<synchronous>, transform_indices = @transform_7, window_bounds = array<i64: 16, 16>}, {pipeline_mode = #tpu.pipeline_mode<synchronous>, transform_indices = @transform_8, window_bounds = array<i64: 1, 16>}, {pipeline_mode = #tpu.pipeline_mode<synchronous>, transform_indices = @transform_9, window_bounds = array<i64: 1, 16>}, {pipeline_mode = #tpu.pipeline_mode<synchronous>, transform_indices = @transform_10, window_bounds = array<i64: 8, 48>}, {pipeline_mode = #tpu.pipeline_mode<synchronous>, transform_indices = @transform_11, window_bounds = array<i64: 16, 48>}, {pipeline_mode = #tpu.pipeline_mode<synchronous>, transform_indices = @transform_12, window_bounds = array<i64: 16, 48>}, {pipeline_mode = #tpu.pipeline_mode<synchronous>, transform_indices = @transform_13, window_bounds = array<i64: 1, 48>}, {pipeline_mode = #tpu.pipeline_mode<synchronous>, transform_indices = @transform_14, window_bounds = array<i64: 16, 48>}, {pipeline_mode = #tpu.pipeline_mode<synchronous>, transform_indices = @transform_15, window_bounds = array<i64: 16, 48>}, {pipeline_mode = #tpu.pipeline_mode<synchronous>, transform_indices = @transform_16, window_bounds = array<i64: 16, 16>}, {pipeline_mode = #tpu.pipeline_mode<synchronous>, transform_indices = @transform_17, window_bounds = array<i64: 1, 16>}, {pipeline_mode = #tpu.pipeline_mode<synchronous>, transform_indices = @transform_18, window_bounds = array<i64: 8, 16>}, {pipeline_mode = #tpu.pipeline_mode<synchronous>, transform_indices = @transform_19, window_bounds = array<i64: 16, 16>}, {pipeline_mode = #tpu.pipeline_mode<synchronous>, transform_indices = @transform_20, window_bounds = array<i64: 16, 16>}, {pipeline_mode = #tpu.pipeline_mode<synchronous>, transform_indices = @transform_21, window_bounds = array<i64: 16, 16>}, {pipeline_mode = #tpu.pipeline_mode<synchronous>, transform_indices = @transform_22, window_bounds = array<i64: 16, 16>}, {pipeline_mode = #tpu.pipeline_mode<synchronous>, transform_indices = @transform_23, window_bounds = array<i64: 8, 16>}, {pipeline_mode = #tpu.pipeline_mode<synchronous>, transform_indices = @transform_24, window_bounds = array<i64: 1, 16>}, {transform_indices = @transform_25, window_bounds = array<i64: 1, 8, 128>}]} {
    %c0 = arith.constant 0 : index
    %c0_0 = arith.constant 0 : index
    %0 = vector.load %arg1[%c0, %c0_0] : memref<8x16xf32, #tpu.memory_space<vmem>>, vector<8x16xf32>
    %c0_1 = arith.constant 0 : index
    %c0_2 = arith.constant 0 : index
    %1 = vector.load %arg2[%c0_1, %c0_2] : memref<8x16xf32, #tpu.memory_space<vmem>>, vector<8x16xf32>
    %c0_3 = arith.constant 0 : index
    %c0_4 = arith.constant 0 : index
    %2 = vector.load %arg3[%c0_3, %c0_4] : memref<8x16xf32, #tpu.memory_space<vmem>>, vector<8x16xf32>
    %c0_5 = arith.constant 0 : index
    %c0_6 = arith.constant 0 : index
    %3 = vector.load %arg4[%c0_5, %c0_6] : memref<8x16xf32, #tpu.memory_space<vmem>>, vector<8x16xf32>
    %c0_i32 = arith.constant 0 : i32
    %cst = arith.constant dense<0xFF800000> : vector<8xf32>
    %4 = vector.multi_reduction <maximumf>, %0, %cst [1] : vector<8x16xf32> to vector<8xf32>
    %5 = vector.shape_cast %4 : vector<8xf32> to vector<8x1xf32>
    %6 = tpu.iota {dimensions = array<i32: 1>} : vector<8x16xi32>
    %7 = vector.broadcast %5 : vector<8x1xf32> to vector<8x16xf32>
    %8 = arith.cmpf oeq, %0, %7 : vector<8x16xf32>
    %c16_i32 = arith.constant 16 : i32
    %9 = vector.broadcast %c16_i32 : i32 to vector<8x16xi32>
    %10 = arith.select %8, %6, %9 : vector<8x16xi1>, vector<8x16xi32>
    %cst_7 = arith.constant dense<2147483647> : vector<8xi32>
    %11 = vector.multi_reduction <minsi>, %10, %cst_7 [1] : vector<8x16xi32> to vector<8xi32>
    %12 = vector.shape_cast %11 : vector<8xi32> to vector<8x1xi32>
    %13 = vector.broadcast %12 : vector<8x1xi32> to vector<8x16xi32>
    %14 = arith.cmpi eq, %6, %13 : vector<8x16xi32>
    %15 = arith.extui %14 : vector<8x16xi1> to vector<8x16xi32>
    %16 = arith.sitofp %15 : vector<8x16xi32> to vector<8x16xf32>
    %c0_8 = arith.constant 0 : index
    %c0_9 = arith.constant 0 : index
    %17 = vector.load %arg7[%c0_8, %c0_9] : memref<16x8xf32, #tpu.memory_space<vmem>>, vector<16x8xf32>
    %cst_10 = arith.constant dense<0.000000e+00> : vector<8x8xf32>
    %18 = tpu.matmul %16, %17, %cst_10 {dimension_numbers = #tpu.dot_dimension_numbers<[1], [0], [0], [1], [0, 0, 1, 1], [], []>} : vector<8x16xf32>, vector<16x8xf32>, vector<8x8xf32> -> vector<8x8xf32>
    %c0_11 = arith.constant 0 : index
    %c0_12 = arith.constant 0 : index
    %19 = vector.load %arg8[%c0_11, %c0_12] : memref<16x16xf32, #tpu.memory_space<vmem>>, vector<16x16xf32>
    %cst_13 = arith.constant dense<0.000000e+00> : vector<8x16xf32>
    %20 = tpu.matmul %1, %19, %cst_13 {dimension_numbers = #tpu.dot_dimension_numbers<[1], [0], [0], [1], [0, 0, 1, 1], [], []>} : vector<8x16xf32>, vector<16x16xf32>, vector<8x16xf32> -> vector<8x16xf32>
    %c0_14 = arith.constant 0 : index
    %c0_15 = arith.constant 0 : index
    %c0_16 = arith.constant 0 : index
    %21 = vector.load %arg6[%c0_14, %c0_15, %c0_16] : memref<8x8x16xf32, #tpu.memory_space<vmem>>, vector<8x8x16xf32>
    %22 = vector.shape_cast %20 : vector<8x16xf32> to vector<8x1x16xf32>
    %23 = vector.broadcast %22 : vector<8x1x16xf32> to vector<8x8x16xf32>
    %24 = arith.addf %21, %23 : vector<8x8x16xf32>
    %c0_17 = arith.constant 0 : index
    %c0_18 = arith.constant 0 : index
    %25 = vector.load %arg9[%c0_17, %c0_18] : memref<1x16xf32, #tpu.memory_space<vmem>>, vector<1x16xf32>
    %26 = vector.shape_cast %25 : vector<1x16xf32> to vector<1x1x16xf32>
    %27 = vector.broadcast %26 : vector<1x1x16xf32> to vector<8x8x16xf32>
    %28 = arith.addf %24, %27 : vector<8x8x16xf32>
    %29 = math.tanh %28 : vector<8x8x16xf32>
    %c0_19 = arith.constant 0 : index
    %c0_20 = arith.constant 0 : index
    %30 = vector.load %arg10[%c0_19, %c0_20] : memref<1x16xf32, #tpu.memory_space<vmem>>, vector<1x16xf32>
    %31 = vector.shape_cast %30 : vector<1x16xf32> to vector<1x1x16xf32>
    %32 = vector.broadcast %31 : vector<1x1x16xf32> to vector<8x8x16xf32>
    %33 = arith.mulf %29, %32 : vector<8x8x16xf32>
    %cst_21 = arith.constant dense<0.000000e+00> : vector<8x8xf32>
    %34 = vector.multi_reduction <add>, %33, %cst_21 [2] : vector<8x8x16xf32> to vector<8x8xf32>
    %cst_22 = arith.constant dense<0xFF800000> : vector<8xf32>
    %35 = vector.multi_reduction <maximumf>, %34, %cst_22 [1] : vector<8x8xf32> to vector<8xf32>
    %36 = vector.shape_cast %35 : vector<8xf32> to vector<8x1xf32>
    %37 = vector.broadcast %36 : vector<8x1xf32> to vector<8x8xf32>
    %38 = arith.subf %34, %37 : vector<8x8xf32>
    %39 = math.exp %38 : vector<8x8xf32>
    %cst_23 = arith.constant dense<0.000000e+00> : vector<8xf32>
    %40 = vector.multi_reduction <add>, %39, %cst_23 [1] : vector<8x8xf32> to vector<8xf32>
    %41 = vector.shape_cast %40 : vector<8xf32> to vector<8x1xf32>
    %42 = vector.broadcast %41 : vector<8x1xf32> to vector<8x8xf32>
    %43 = arith.divf %39, %42 : vector<8x8xf32>
    %44 = vector.shape_cast %43 : vector<8x8xf32> to vector<8x1x8xf32>
    %c0_24 = arith.constant 0 : index
    %c0_25 = arith.constant 0 : index
    %c0_26 = arith.constant 0 : index
    %45 = vector.load %arg5[%c0_24, %c0_25, %c0_26] : memref<8x8x16xf32, #tpu.memory_space<vmem>>, vector<8x8x16xf32>
    "tpu.trace_start"() <{level = 10 : i32, message = "bql,blc->bqc"}> : () -> ()
    %cst_27 = arith.constant dense<0.000000e+00> : vector<8x1x16xf32>
    %46 = tpu.matmul %44, %45, %cst_27 {dimension_numbers = #tpu.dot_dimension_numbers<[2], [1], [1], [2], [0, 0, 0, 1, 1, 2], [0], [0]>} : vector<8x1x8xf32>, vector<8x8x16xf32>, vector<8x1x16xf32> -> vector<8x1x16xf32>
    "tpu.trace_stop"() : () -> ()
    %47 = vector.shape_cast %46 : vector<8x1x16xf32> to vector<8x16xf32>
    %c0_28 = arith.constant 0 : index
    %c0_29 = arith.constant 0 : index
    %48 = vector.load %arg11[%c0_28, %c0_29] : memref<8x48xf32, #tpu.memory_space<vmem>>, vector<8x48xf32>
    %cst_30 = arith.constant dense<0.000000e+00> : vector<8x48xf32>
    %49 = tpu.matmul %18, %48, %cst_30 {dimension_numbers = #tpu.dot_dimension_numbers<[1], [0], [0], [1], [0, 0, 1, 1], [], []>} : vector<8x8xf32>, vector<8x48xf32>, vector<8x48xf32> -> vector<8x48xf32>
    %c0_31 = arith.constant 0 : index
    %c0_32 = arith.constant 0 : index
    %50 = vector.load %arg12[%c0_31, %c0_32] : memref<16x48xf32, #tpu.memory_space<vmem>>, vector<16x48xf32>
    %cst_33 = arith.constant dense<0.000000e+00> : vector<8x48xf32>
    %51 = tpu.matmul %47, %50, %cst_33 {dimension_numbers = #tpu.dot_dimension_numbers<[1], [0], [0], [1], [0, 0, 1, 1], [], []>} : vector<8x16xf32>, vector<16x48xf32>, vector<8x48xf32> -> vector<8x48xf32>
    %52 = arith.addf %49, %51 : vector<8x48xf32>
    %c0_34 = arith.constant 0 : index
    %c0_35 = arith.constant 0 : index
    %53 = vector.load %arg13[%c0_34, %c0_35] : memref<16x48xf32, #tpu.memory_space<vmem>>, vector<16x48xf32>
    %cst_36 = arith.constant dense<0.000000e+00> : vector<8x48xf32>
    %54 = tpu.matmul %3, %53, %cst_36 {dimension_numbers = #tpu.dot_dimension_numbers<[1], [0], [0], [1], [0, 0, 1, 1], [], []>} : vector<8x16xf32>, vector<16x48xf32>, vector<8x48xf32> -> vector<8x48xf32>
    %55 = arith.addf %52, %54 : vector<8x48xf32>
    %c0_37 = arith.constant 0 : index
    %c0_38 = arith.constant 0 : index
    %56 = vector.load %arg14[%c0_37, %c0_38] : memref<1x48xf32, #tpu.memory_space<vmem>>, vector<1x48xf32>
    %57 = vector.broadcast %56 : vector<1x48xf32> to vector<8x48xf32>
    %58 = arith.addf %55, %57 : vector<8x48xf32>
    %c0_39 = arith.constant 0 : index
    %c0_40 = arith.constant 0 : index
    %59 = vector.load %arg19[%c0_39, %c0_40] : memref<8x16xf32, #tpu.memory_space<vmem>>, vector<8x16xf32>
    %cst_41 = arith.constant dense<0.000000e+00> : vector<8x16xf32>
    %60 = tpu.matmul %18, %59, %cst_41 {dimension_numbers = #tpu.dot_dimension_numbers<[1], [0], [0], [1], [0, 0, 1, 1], [], []>} : vector<8x8xf32>, vector<8x16xf32>, vector<8x16xf32> -> vector<8x16xf32>
    %c0_42 = arith.constant 0 : index
    %c0_43 = arith.constant 0 : index
    %61 = vector.load %arg20[%c0_42, %c0_43] : memref<16x16xf32, #tpu.memory_space<vmem>>, vector<16x16xf32>
    %cst_44 = arith.constant dense<0.000000e+00> : vector<8x16xf32>
    %62 = tpu.matmul %47, %61, %cst_44 {dimension_numbers = #tpu.dot_dimension_numbers<[1], [0], [0], [1], [0, 0, 1, 1], [], []>} : vector<8x16xf32>, vector<16x16xf32>, vector<8x16xf32> -> vector<8x16xf32>
    %63 = arith.addf %60, %62 : vector<8x16xf32>
    %c0_45 = arith.constant 0 : index
    %c0_46 = arith.constant 0 : index
    %64 = vector.load %arg21[%c0_45, %c0_46] : memref<16x16xf32, #tpu.memory_space<vmem>>, vector<16x16xf32>
    %cst_47 = arith.constant dense<0.000000e+00> : vector<8x16xf32>
    %65 = tpu.matmul %3, %64, %cst_47 {dimension_numbers = #tpu.dot_dimension_numbers<[1], [0], [0], [1], [0, 0, 1, 1], [], []>} : vector<8x16xf32>, vector<16x16xf32>, vector<8x16xf32> -> vector<8x16xf32>
    %66 = arith.addf %63, %65 : vector<8x16xf32>
    %c0_48 = arith.constant 0 : index
    %c0_49 = arith.constant 0 : index
    %67 = vector.load %arg15[%c0_48, %c0_49] : memref<16x48xf32, #tpu.memory_space<vmem>>, vector<16x48xf32>
    %cst_50 = arith.constant dense<0.000000e+00> : vector<8x48xf32>
    %68 = tpu.matmul %1, %67, %cst_50 {dimension_numbers = #tpu.dot_dimension_numbers<[1], [0], [0], [1], [0, 0, 1, 1], [], []>} : vector<8x16xf32>, vector<16x48xf32>, vector<8x48xf32> -> vector<8x48xf32>
    %69 = arith.addf %58, %68 : vector<8x48xf32>
    %c0_51 = arith.constant 0 : index
    %c0_52 = arith.constant 0 : index
    %70 = vector.load %arg16[%c0_51, %c0_52] : memref<16x48xf32, #tpu.memory_space<vmem>>, vector<16x48xf32>
    %cst_53 = arith.constant dense<0.000000e+00> : vector<8x48xf32>
    %71 = tpu.matmul %2, %70, %cst_53 {dimension_numbers = #tpu.dot_dimension_numbers<[1], [0], [0], [1], [0, 0, 1, 1], [], []>} : vector<8x16xf32>, vector<16x48xf32>, vector<8x48xf32> -> vector<8x48xf32>
    %72 = arith.addf %69, %71 : vector<8x48xf32>
    %73 = vector.extract_strided_slice %72 {offsets = [0, 0], sizes = [8, 16], strides = [1, 1]} : vector<8x48xf32> to vector<8x16xf32>
    %cst_54 = arith.constant 0.000000e+00 : f32
    %74 = vector.broadcast %cst_54 : f32 to vector<8x16xf32>
    %75 = arith.subf %74, %73 : vector<8x16xf32>
    %76 = math.exp %75 : vector<8x16xf32>
    %cst_55 = arith.constant 1.000000e+00 : f32
    %77 = vector.broadcast %cst_55 : f32 to vector<8x16xf32>
    %78 = arith.addf %77, %76 : vector<8x16xf32>
    %cst_56 = arith.constant 1.000000e+00 : f32
    %79 = vector.broadcast %cst_56 : f32 to vector<8x16xf32>
    %80 = arith.divf %79, %78 : vector<8x16xf32>
    %81 = vector.extract_strided_slice %72 {offsets = [0, 16], sizes = [8, 16], strides = [1, 1]} : vector<8x48xf32> to vector<8x16xf32>
    %cst_57 = arith.constant 0.000000e+00 : f32
    %82 = vector.broadcast %cst_57 : f32 to vector<8x16xf32>
    %83 = arith.subf %82, %81 : vector<8x16xf32>
    %84 = math.exp %83 : vector<8x16xf32>
    %cst_58 = arith.constant 1.000000e+00 : f32
    %85 = vector.broadcast %cst_58 : f32 to vector<8x16xf32>
    %86 = arith.addf %85, %84 : vector<8x16xf32>
    %cst_59 = arith.constant 1.000000e+00 : f32
    %87 = vector.broadcast %cst_59 : f32 to vector<8x16xf32>
    %88 = arith.divf %87, %86 : vector<8x16xf32>
    %89 = vector.extract_strided_slice %72 {offsets = [0, 32], sizes = [8, 16], strides = [1, 1]} : vector<8x48xf32> to vector<8x16xf32>
    %cst_60 = arith.constant 0.000000e+00 : f32
    %90 = vector.broadcast %cst_60 : f32 to vector<8x16xf32>
    %91 = arith.subf %90, %89 : vector<8x16xf32>
    %92 = math.exp %91 : vector<8x16xf32>
    %cst_61 = arith.constant 1.000000e+00 : f32
    %93 = vector.broadcast %cst_61 : f32 to vector<8x16xf32>
    %94 = arith.addf %93, %92 : vector<8x16xf32>
    %cst_62 = arith.constant 1.000000e+00 : f32
    %95 = vector.broadcast %cst_62 : f32 to vector<8x16xf32>
    %96 = arith.divf %95, %94 : vector<8x16xf32>
    %c0_63 = arith.constant 0 : index
    %c0_64 = arith.constant 0 : index
    %97 = vector.load %arg17[%c0_63, %c0_64] : memref<16x16xf32, #tpu.memory_space<vmem>>, vector<16x16xf32>
    %cst_65 = arith.constant dense<0.000000e+00> : vector<8x16xf32>
    %98 = tpu.matmul %1, %97, %cst_65 {dimension_numbers = #tpu.dot_dimension_numbers<[1], [0], [0], [1], [0, 0, 1, 1], [], []>} : vector<8x16xf32>, vector<16x16xf32>, vector<8x16xf32> -> vector<8x16xf32>
    %c0_66 = arith.constant 0 : index
    %c0_67 = arith.constant 0 : index
    %99 = vector.load %arg18[%c0_66, %c0_67] : memref<1x16xf32, #tpu.memory_space<vmem>>, vector<1x16xf32>
    %100 = vector.broadcast %99 : vector<1x16xf32> to vector<8x16xf32>
    %101 = arith.addf %98, %100 : vector<8x16xf32>
    %102 = math.tanh %101 : vector<8x16xf32>
    %103 = arith.mulf %88, %2 : vector<8x16xf32>
    %104 = arith.mulf %80, %102 : vector<8x16xf32>
    %105 = arith.addf %103, %104 : vector<8x16xf32>
    %106 = math.tanh %105 : vector<8x16xf32>
    %107 = arith.addf %106, %66 : vector<8x16xf32>
    %108 = arith.mulf %96, %107 : vector<8x16xf32>
    %c0_68 = arith.constant 0 : index
    %c0_69 = arith.constant 0 : index
    %109 = vector.load %arg15[%c0_68, %c0_69] : memref<16x48xf32, #tpu.memory_space<vmem>>, vector<16x48xf32>
    %cst_70 = arith.constant dense<0.000000e+00> : vector<8x48xf32>
    %110 = tpu.matmul %108, %109, %cst_70 {dimension_numbers = #tpu.dot_dimension_numbers<[1], [0], [0], [1], [0, 0, 1, 1], [], []>} : vector<8x16xf32>, vector<16x48xf32>, vector<8x48xf32> -> vector<8x48xf32>
    %111 = arith.addf %58, %110 : vector<8x48xf32>
    %c0_71 = arith.constant 0 : index
    %c0_72 = arith.constant 0 : index
    %112 = vector.load %arg16[%c0_71, %c0_72] : memref<16x48xf32, #tpu.memory_space<vmem>>, vector<16x48xf32>
    %cst_73 = arith.constant dense<0.000000e+00> : vector<8x48xf32>
    %113 = tpu.matmul %105, %112, %cst_73 {dimension_numbers = #tpu.dot_dimension_numbers<[1], [0], [0], [1], [0, 0, 1, 1], [], []>} : vector<8x16xf32>, vector<16x48xf32>, vector<8x48xf32> -> vector<8x48xf32>
    %114 = arith.addf %111, %113 : vector<8x48xf32>
    %115 = vector.extract_strided_slice %114 {offsets = [0, 0], sizes = [8, 16], strides = [1, 1]} : vector<8x48xf32> to vector<8x16xf32>
    %cst_74 = arith.constant 0.000000e+00 : f32
    %116 = vector.broadcast %cst_74 : f32 to vector<8x16xf32>
    %117 = arith.subf %116, %115 : vector<8x16xf32>
    %118 = math.exp %117 : vector<8x16xf32>
    %cst_75 = arith.constant 1.000000e+00 : f32
    %119 = vector.broadcast %cst_75 : f32 to vector<8x16xf32>
    %120 = arith.addf %119, %118 : vector<8x16xf32>
    %cst_76 = arith.constant 1.000000e+00 : f32
    %121 = vector.broadcast %cst_76 : f32 to vector<8x16xf32>
    %122 = arith.divf %121, %120 : vector<8x16xf32>
    %123 = vector.extract_strided_slice %114 {offsets = [0, 16], sizes = [8, 16], strides = [1, 1]} : vector<8x48xf32> to vector<8x16xf32>
    %cst_77 = arith.constant 0.000000e+00 : f32
    %124 = vector.broadcast %cst_77 : f32 to vector<8x16xf32>
    %125 = arith.subf %124, %123 : vector<8x16xf32>
    %126 = math.exp %125 : vector<8x16xf32>
    %cst_78 = arith.constant 1.000000e+00 : f32
    %127 = vector.broadcast %cst_78 : f32 to vector<8x16xf32>
    %128 = arith.addf %127, %126 : vector<8x16xf32>
    %cst_79 = arith.constant 1.000000e+00 : f32
    %129 = vector.broadcast %cst_79 : f32 to vector<8x16xf32>
    %130 = arith.divf %129, %128 : vector<8x16xf32>
    %131 = vector.extract_strided_slice %114 {offsets = [0, 32], sizes = [8, 16], strides = [1, 1]} : vector<8x48xf32> to vector<8x16xf32>
    %cst_80 = arith.constant 0.000000e+00 : f32
    %132 = vector.broadcast %cst_80 : f32 to vector<8x16xf32>
    %133 = arith.subf %132, %131 : vector<8x16xf32>
    %134 = math.exp %133 : vector<8x16xf32>
    %cst_81 = arith.constant 1.000000e+00 : f32
    %135 = vector.broadcast %cst_81 : f32 to vector<8x16xf32>
    %136 = arith.addf %135, %134 : vector<8x16xf32>
    %cst_82 = arith.constant 1.000000e+00 : f32
    %137 = vector.broadcast %cst_82 : f32 to vector<8x16xf32>
    %138 = arith.divf %137, %136 : vector<8x16xf32>
    %c0_83 = arith.constant 0 : index
    %c0_84 = arith.constant 0 : index
    %139 = vector.load %arg17[%c0_83, %c0_84] : memref<16x16xf32, #tpu.memory_space<vmem>>, vector<16x16xf32>
    %cst_85 = arith.constant dense<0.000000e+00> : vector<8x16xf32>
    %140 = tpu.matmul %108, %139, %cst_85 {dimension_numbers = #tpu.dot_dimension_numbers<[1], [0], [0], [1], [0, 0, 1, 1], [], []>} : vector<8x16xf32>, vector<16x16xf32>, vector<8x16xf32> -> vector<8x16xf32>
    %c0_86 = arith.constant 0 : index
    %c0_87 = arith.constant 0 : index
    %141 = vector.load %arg18[%c0_86, %c0_87] : memref<1x16xf32, #tpu.memory_space<vmem>>, vector<1x16xf32>
    %142 = vector.broadcast %141 : vector<1x16xf32> to vector<8x16xf32>
    %143 = arith.addf %140, %142 : vector<8x16xf32>
    %144 = math.tanh %143 : vector<8x16xf32>
    %145 = arith.mulf %130, %105 : vector<8x16xf32>
    %146 = arith.mulf %122, %144 : vector<8x16xf32>
    %147 = arith.addf %145, %146 : vector<8x16xf32>
    %148 = math.tanh %147 : vector<8x16xf32>
    %149 = arith.addf %148, %66 : vector<8x16xf32>
    %150 = arith.mulf %138, %149 : vector<8x16xf32>
    %c0_88 = arith.constant 0 : index
    %c0_89 = arith.constant 0 : index
    %151 = vector.load %arg22[%c0_88, %c0_89] : memref<16x16xf32, #tpu.memory_space<vmem>>, vector<16x16xf32>
    %cst_90 = arith.constant dense<0.000000e+00> : vector<8x16xf32>
    %152 = tpu.matmul %150, %151, %cst_90 {dimension_numbers = #tpu.dot_dimension_numbers<[1], [0], [0], [1], [0, 0, 1, 1], [], []>} : vector<8x16xf32>, vector<16x16xf32>, vector<8x16xf32> -> vector<8x16xf32>
    %c0_91 = arith.constant 0 : index
    %c0_92 = arith.constant 0 : index
    %153 = vector.load %arg23[%c0_91, %c0_92] : memref<16x16xf32, #tpu.memory_space<vmem>>, vector<16x16xf32>
    %cst_93 = arith.constant dense<0.000000e+00> : vector<8x16xf32>
    %154 = tpu.matmul %47, %153, %cst_93 {dimension_numbers = #tpu.dot_dimension_numbers<[1], [0], [0], [1], [0, 0, 1, 1], [], []>} : vector<8x16xf32>, vector<16x16xf32>, vector<8x16xf32> -> vector<8x16xf32>
    %155 = arith.addf %152, %154 : vector<8x16xf32>
    %c0_94 = arith.constant 0 : index
    %c0_95 = arith.constant 0 : index
    %156 = vector.load %arg24[%c0_94, %c0_95] : memref<8x16xf32, #tpu.memory_space<vmem>>, vector<8x16xf32>
    %cst_96 = arith.constant dense<0.000000e+00> : vector<8x16xf32>
    %157 = tpu.matmul %18, %156, %cst_96 {dimension_numbers = #tpu.dot_dimension_numbers<[1], [0], [0], [1], [0, 0, 1, 1], [], []>} : vector<8x8xf32>, vector<8x16xf32>, vector<8x16xf32> -> vector<8x16xf32>
    %158 = arith.addf %155, %157 : vector<8x16xf32>
    %c0_97 = arith.constant 0 : index
    %c0_98 = arith.constant 0 : index
    %159 = vector.load %arg25[%c0_97, %c0_98] : memref<1x16xf32, #tpu.memory_space<vmem>>, vector<1x16xf32>
    %160 = vector.broadcast %159 : vector<1x16xf32> to vector<8x16xf32>
    %161 = arith.addf %158, %160 : vector<8x16xf32>
    %cst_99 = arith.constant 0.000000e+00 : f32
    %162 = vector.broadcast %cst_99 : f32 to vector<8x64xf32>
    %163 = tpu.concatenate %161, %150, %147, %47, %162 in 1 : vector<8x16xf32>, vector<8x16xf32>, vector<8x16xf32>, vector<8x16xf32>, vector<8x64xf32> -> vector<8x128xf32>
    %164 = arith.index_cast %c0_i32 : i32 to index
    %c0_100 = arith.constant 0 : index
    %c0_101 = arith.constant 0 : index
    %165 = vector.load %arg26[%164, %c0_100, %c0_101] : memref<1x8x128xf32, #tpu.memory_space<vmem>>, vector<1x8x128xf32>
    %166 = vector.shape_cast %165 : vector<1x8x128xf32> to vector<8x128xf32>
    %167 = vector.shape_cast %163 : vector<8x128xf32> to vector<1x8x128xf32>
    tpu.vector_store %arg26[%164, %c0_100, %c0_101], %167 {strides = array<i32>} : memref<1x8x128xf32, #tpu.memory_space<vmem>>, vector<1x8x128xf32>,
    %c1_i32 = arith.constant 1 : i32
    return
  }
  func.func @transform_0(%arg0: i32) -> (i32, i32) {
    %c0_i32 = arith.constant 0 : i32
    %c0_i32_0 = arith.constant 0 : i32
    return %arg0, %c0_i32 : i32, i32
  }
  func.func @transform_1(%arg0: i32) -> (i32, i32) {
    %c0_i32 = arith.constant 0 : i32
    %c0_i32_0 = arith.constant 0 : i32
    return %arg0, %c0_i32 : i32, i32
  }
  func.func @transform_2(%arg0: i32) -> (i32, i32) {
    %c0_i32 = arith.constant 0 : i32
    %c0_i32_0 = arith.constant 0 : i32
    return %arg0, %c0_i32 : i32, i32
  }
  func.func @transform_3(%arg0: i32) -> (i32, i32) {
    %c0_i32 = arith.constant 0 : i32
    %c0_i32_0 = arith.constant 0 : i32
    return %arg0, %c0_i32 : i32, i32
  }
  func.func @transform_4(%arg0: i32) -> (i32, i32, i32) {
    %c0_i32 = arith.constant 0 : i32
    %c0_i32_0 = arith.constant 0 : i32
    %c0_i32_1 = arith.constant 0 : i32
    return %arg0, %c0_i32, %c0_i32_0 : i32, i32, i32
  }
  func.func @transform_5(%arg0: i32) -> (i32, i32, i32) {
    %c0_i32 = arith.constant 0 : i32
    %c0_i32_0 = arith.constant 0 : i32
    %c0_i32_1 = arith.constant 0 : i32
    return %arg0, %c0_i32, %c0_i32_0 : i32, i32, i32
  }
  func.func @transform_6(%arg0: i32) -> (i32, i32) {
    %c0_i32 = arith.constant 0 : i32
    %c0_i32_0 = arith.constant 0 : i32
    %c0_i32_1 = arith.constant 0 : i32
    return %c0_i32, %c0_i32_0 : i32, i32
  }
  func.func @transform_7(%arg0: i32) -> (i32, i32) {
    %c0_i32 = arith.constant 0 : i32
    %c0_i32_0 = arith.constant 0 : i32
    %c0_i32_1 = arith.constant 0 : i32
    return %c0_i32, %c0_i32_0 : i32, i32
  }
  func.func @transform_8(%arg0: i32) -> (i32, i32) {
    %c0_i32 = arith.constant 0 : i32
    %c0_i32_0 = arith.constant 0 : i32
    %c0_i32_1 = arith.constant 0 : i32
    return %c0_i32, %c0_i32_0 : i32, i32
  }
  func.func @transform_9(%arg0: i32) -> (i32, i32) {
    %c0_i32 = arith.constant 0 : i32
    %c0_i32_0 = arith.constant 0 : i32
    %c0_i32_1 = arith.constant 0 : i32
    return %c0_i32, %c0_i32_0 : i32, i32
  }
  func.func @transform_10(%arg0: i32) -> (i32, i32) {
    %c0_i32 = arith.constant 0 : i32
    %c0_i32_0 = arith.constant 0 : i32
    %c0_i32_1 = arith.constant 0 : i32
    return %c0_i32, %c0_i32_0 : i32, i32
  }
  func.func @transform_11(%arg0: i32) -> (i32, i32) {
    %c0_i32 = arith.constant 0 : i32
    %c0_i32_0 = arith.constant 0 : i32
    %c0_i32_1 = arith.constant 0 : i32
    return %c0_i32, %c0_i32_0 : i32, i32
  }
  func.func @transform_12(%arg0: i32) -> (i32, i32) {
    %c0_i32 = arith.constant 0 : i32
    %c0_i32_0 = arith.constant 0 : i32
    %c0_i32_1 = arith.constant 0 : i32
    return %c0_i32, %c0_i32_0 : i32, i32
  }
  func.func @transform_13(%arg0: i32) -> (i32, i32) {
    %c0_i32 = arith.constant 0 : i32
    %c0_i32_0 = arith.constant 0 : i32
    %c0_i32_1 = arith.constant 0 : i32
    return %c0_i32, %c0_i32_0 : i32, i32
  }
  func.func @transform_14(%arg0: i32) -> (i32, i32) {
    %c0_i32 = arith.constant 0 : i32
    %c0_i32_0 = arith.constant 0 : i32
    %c0_i32_1 = arith.constant 0 : i32
    return %c0_i32, %c0_i32_0 : i32, i32
  }
  func.func @transform_15(%arg0: i32) -> (i32, i32) {
    %c0_i32 = arith.constant 0 : i32
    %c0_i32_0 = arith.constant 0 : i32
    %c0_i32_1 = arith.constant 0 : i32
    return %c0_i32, %c0_i32_0 : i32, i32
  }
  func.func @transform_16(%arg0: i32) -> (i32, i32) {
    %c0_i32 = arith.constant 0 : i32
    %c0_i32_0 = arith.constant 0 : i32
    %c0_i32_1 = arith.constant 0 : i32
    return %c0_i32, %c0_i32_0 : i32, i32
  }
  func.func @transform_17(%arg0: i32) -> (i32, i32) {
    %c0_i32 = arith.constant 0 : i32
    %c0_i32_0 = arith.constant 0 : i32
    %c0_i32_1 = arith.constant 0 : i32
    return %c0_i32, %c0_i32_0 : i32, i32
  }
  func.func @transform_18(%arg0: i32) -> (i32, i32) {
    %c0_i32 = arith.constant 0 : i32
    %c0_i32_0 = arith.constant 0 : i32
    %c0_i32_1 = arith.constant 0 : i32
    return %c0_i32, %c0_i32_0 : i32, i32
  }
  func.func @transform_19(%arg0: i32) -> (i32, i32) {
    %c0_i32 = arith.constant 0 : i32
    %c0_i32_0 = arith.constant 0 : i32
    %c0_i32_1 = arith.constant 0 : i32
    return %c0_i32, %c0_i32_0 : i32, i32
  }
  func.func @transform_20(%arg0: i32) -> (i32, i32) {
    %c0_i32 = arith.constant 0 : i32
    %c0_i32_0 = arith.constant 0 : i32
    %c0_i32_1 = arith.constant 0 : i32
    return %c0_i32, %c0_i32_0 : i32, i32
  }
  func.func @transform_21(%arg0: i32) -> (i32, i32) {
    %c0_i32 = arith.constant 0 : i32
    %c0_i32_0 = arith.constant 0 : i32
    %c0_i32_1 = arith.constant 0 : i32
    return %c0_i32, %c0_i32_0 : i32, i32
  }
  func.func @transform_22(%arg0: i32) -> (i32, i32) {
    %c0_i32 = arith.constant 0 : i32
    %c0_i32_0 = arith.constant 0 : i32
    %c0_i32_1 = arith.constant 0 : i32
    return %c0_i32, %c0_i32_0 : i32, i32
  }
  func.func @transform_23(%arg0: i32) -> (i32, i32) {
    %c0_i32 = arith.constant 0 : i32
    %c0_i32_0 = arith.constant 0 : i32
    %c0_i32_1 = arith.constant 0 : i32
    return %c0_i32, %c0_i32_0 : i32, i32
  }
  func.func @transform_24(%arg0: i32) -> (i32, i32) {
    %c0_i32 = arith.constant 0 : i32
    %c0_i32_0 = arith.constant 0 : i32
    %c0_i32_1 = arith.constant 0 : i32
    return %c0_i32, %c0_i32_0 : i32, i32
  }
  func.func @transform_25(%arg0: i32) -> (i32, i32, i32) {
    %c0_i32 = arith.constant 0 : i32
    %c0_i32_0 = arith.constant 0 : i32
    %c0_i32_1 = arith.constant 0 : i32
    return %c0_i32, %arg0, %c0_i32_0 : i32, i32, i32
  }
}

</mosaic_0001>

<bundles_post_ra>
// kernel: tpu_custom_call.1
= control target key start
LH: loop header
LB: loop body
LE: loop exit
PB: predicated region body
PF: predicated region fallthrough
CT: control target
= control target key end

     0   :  { %s4172_s0 = inlined_call_operand.hbm [shape: f32[8,16], index: 0, kind: input, shape index: {}]   ;;  %s4173_s1 = inlined_call_operand.hbm [shape: f32[8,16], index: 1, kind: input, shape index: {}]   ;;  %s4174_s2 = inlined_call_operand.hbm [shape: f32[8,16], index: 2, kind: input, shape index: {}]   ;;  %s4175_s3 = inlined_call_operand.hbm [shape: f32[8,16], index: 3, kind: input, shape index: {}]   ;;  %s4176_s4 = inlined_call_operand.hbm [shape: f32[8,8,16], index: 4, kind: input, shape index: {}]   ;;  %s4177_s5 = inlined_call_operand.hbm [shape: f32[8,8,16], index: 5, kind: input, shape index: {}]   ;;  %s4178_s6 = inlined_call_operand.vmem [shape: f32[16,8], index: 6, kind: input, shape index: {}]   ;;  %s4179_s7 = inlined_call_operand.vmem [shape: f32[16,16], index: 7, kind: input, shape index: {}]   ;;  %s4180_s8 = inlined_call_operand.hbm [shape: f32[1,16], index: 8, kind: input, shape index: {}]   ;;  %s4181_s9 = inlined_call_operand.hbm [shape: f32[1,16], index: 9, kind: input, shape index: {}]   ;;  %s4182_s10 = inlined_call_operand.hbm [shape: f32[8,48], index: 10, kind: input, shape index: {}]   ;;  %s4183_s11 = inlined_call_operand.vmem [shape: f32[16,48], index: 11, kind: input, shape index: {}]   ;;  %s4184_s12 = inlined_call_operand.hbm [shape: f32[16,48], index: 12, kind: input, shape index: {}]   ;;  %s4185_s13 = inlined_call_operand.hbm [shape: f32[1,48], index: 13, kind: input, shape index: {}]   ;;  %s4186_s14 = inlined_call_operand.vmem [shape: f32[16,48], index: 14, kind: input, shape index: {}]   ;;  %s4187_s15 = inlined_call_operand.hbm [shape: f32[16,48], index: 15, kind: input, shape index: {}]   ;;  %s4188_s16 = inlined_call_operand.hbm [shape: f32[16,16], index: 16, kind: input, shape index: {}]   ;;  %s4189_s17 = inlined_call_operand.hbm [shape: f32[1,16], index: 17, kind: input, shape index: {}]   ;;  %s4190_s18 = inlined_call_operand.hbm [shape: f32[8,16], index: 18, kind: input, shape index: {}]   ;;  %s4191_s19 = inlined_call_operand.hbm [shape: f32[16,16], index: 19, kind: input, shape index: {}]   ;;  %s4192_s20 = inlined_call_operand.hbm [shape: f32[16,16], index: 20, kind: input, shape index: {}]   ;;  %s4193_s21 = inlined_call_operand.hbm [shape: f32[16,16], index: 21, kind: input, shape index: {}]   ;;  %s4194_s22 = inlined_call_operand.vmem [shape: f32[16,16], index: 22, kind: input, shape index: {}]   ;;  %s4195_s23 = inlined_call_operand.hbm [shape: f32[8,16], index: 23, kind: input, shape index: {}]   ;;  %s4196_s24 = inlined_call_operand.vmem [shape: f32[1,16], index: 24, kind: input, shape index: {}]   ;;  %s4197_s25 = inlined_call_operand.hbm [shape: f32[1,8,128], index: 25, kind: output, shape index: {}]  }
   0x1   :  { %4200 = sst [smem:[#allocation44_spill]] %s4172_s0 }
   0x2   :  { %4201 = sst [smem:[#allocation45_spill]] %s4173_s1 }
   0x3   :  { %4202 = sst [smem:[#allocation46_spill]] %s4174_s2 }
   0x4   :  { %4203 = sst [smem:[#allocation47_spill]] %s4175_s3 }
   0x5   :  { %4204 = sst [smem:[#allocation48_spill]] %s4176_s4 }
   0x6   :  { %4205 = sst [smem:[#allocation49_spill]] %s4177_s5 }
   0x7   :  { %4206 = sst [smem:[#allocation50_spill]] %s4178_s6 }
   0x8   :  { %4207 = sst [smem:[#allocation51_spill]] %s4179_s7 }
   0x9   :  { %4208 = sst [smem:[#allocation52_spill]] %s4180_s8 }
   0xa   :  { %4209 = sst [smem:[#allocation53_spill]] %s4181_s9 }
   0xb   :  { %4210 = sst [smem:[#allocation54_spill]] %s4197_s25 }
   0xc   :  { %30 = vsyncpa [#allocation3], 0 }
   0xd   :  { %31 = vsyncpa [#allocation6], 0 }
   0xe   :  { %32 = vsyncpa [#allocation9], 0 }
   0xf   :  { %33 = vsyncpa [#allocation12], 0 }
  0x10   :  { %34 = vsyncpa [#allocation15], 0 }
  0x11   :  { %35 = vsyncpa [#allocation18], 0 }
  0x12   :  { %36 = vsyncpa [#allocation21], 0 }
  0x13   :  { %37 = vsyncpa [#allocation24], 0 }
  0x14   :  { %38 = vsyncpa [#allocation27], 0 }
  0x15   :  { %39 = vsyncpa [#allocation30], 0 }
  0x16   :  { %40 = vsyncpa [#allocation4], 0  ;;  %s3574_s29 = smov [#allocation5]   ;;  %s3575_s6 = smov [#allocation8]  }
  0x17   :  { %s57_s2 = sshll.u32 %s3574_s29, 4  ;;  %s77_s30 = sshll.u32 %s3575_s6, 4  ;;  %s58_s2 = int_to_ptr.vmem [resolvable:$true] %s57_s2  ;;  %s78_s30 = int_to_ptr.vmem [resolvable:$true] %s77_s30 }
  0x18   :  { %s3160_s7 = scalar_lea.vmem %s58_s2, 128  ;;  %p3165_p1 = scmp.lt.s32.totalorder %s58_s2, %s58_s2 }
  0x19   :  { %p3161_p0 = scmp.ne.s32.totalorder %s58_s2, %s3160_s7  ;;  %p3166_p2 = scmp.lt.s32.totalorder %s3160_s7, %s3160_s7 }
  0x1b   :  { %p3167_p3 = por %p3166_p2, %p3165_p1 }
  0x1d   :  { %p3168_p4 = pnand %p3167_p3, %p3161_p0 }
  0x1f   :  { %3171 = shalt.err (!%p3168_p4)
}
  0x20   :  { %s4211_s1 = sld [smem:[#allocation45_spill]]  ;;  %s3180_s8 = scalar_lea.vmem %s78_s30, 128 }
  0x21   :  { %p3181_p5 = scmp.ne.s32.totalorder %s78_s30, %s3180_s8  ;;  %p3185_p6 = scmp.lt.s32.totalorder %s78_s30, %s78_s30 }
  0x22   :  { %p3186_p7 = scmp.lt.s32.totalorder %s3180_s8, %s3180_s8 }
  0x24   :  { %p3187_p8 = por %p3186_p7, %p3185_p6 }
  0x26   :  { %60 = dma.hbm_to_vmem [thread:$0]  %s4211_s1, 128, %s58_s2, [#allocation6]  }
  0x27   :  { %p3188_p9 = pnand %p3187_p8, %p3181_p5 }
  0x29   :  { %3191 = shalt.err (!%p3188_p9)
}
  0x2a   :  { %s4212_s28 = sld [smem:[#allocation47_spill]]  ;;  %s3576_s9 = smov [#allocation11]  }
  0x2b   :  { %s98_s5 = sshll.u32 %s3576_s9, 4  ;;  %s3577_s0 = smov [#allocation14]   ;;  %s99_s5 = int_to_ptr.vmem [resolvable:$true] %s98_s5 }
  0x2c   :  { %s125_s29 = sshll.u32 %s3577_s0, 4  ;;  %s3200_s6 = scalar_lea.vmem %s99_s5, 1024  ;;  %s126_s29 = int_to_ptr.vmem [resolvable:$true] %s125_s29 }
  0x2d   :  { %p3201_p10 = scmp.ne.s32.totalorder %s99_s5, %s3200_s6  ;;  %p3205_p11 = scmp.lt.s32.totalorder %s99_s5, %s99_s5 }
  0x2e   :  { %p3206_p12 = scmp.lt.s32.totalorder %s3200_s6, %s3200_s6 }
  0x30   :  { %80 = dma.hbm_to_vmem [thread:$0]  %s4212_s28, 128, %s78_s30, [#allocation9]  }
  0x31   :  { %p3207_p13 = por %p3206_p12, %p3205_p11 }
  0x33   :  { %p3208_p0 = pnand %p3207_p13, %p3201_p10 }
  0x35   :  { %3211 = shalt.err (!%p3208_p0)
}
  0x36   :  { %s3578_s2 = smov 128   ;;  %s3579_s7 = smov 8  }
  0x37   :  { %s4213_s26 = sld [smem:[#allocation49_spill]]  ;;  %s3220_s1 = scalar_lea.vmem %s126_s29, 16 }
  0x38   :  { %p3221_p1 = scmp.ne.s32.totalorder %s126_s29, %s3220_s1  ;;  %s3224_s8 = scalar_lea.vmem %s126_s29, 32 }
  0x39   :  { %p3225_p2 = scmp.lt.s32.totalorder %s126_s29, %s126_s29  ;;  %p3226_p3 = scmp.lt.s32.totalorder %s3224_s8, %s3220_s1 }
  0x3b   :  { %p3227_p4 = por %p3226_p3, %p3225_p2 }
  0x3d   :  { %104 = dma.hbm_to_vmem [thread:$0]  %s4213_s26, 1024, %s99_s5, [#allocation12], %s3578_s2, %s3578_s2, %s3579_s7  }
  0x3e   :  { %p3228_p5 = pnand %p3227_p4, %p3221_p1 }
  0x40   :  { %3231 = shalt.err (!%p3228_p5)
}
  0x41   :  { %s4214_s28 = sld [smem:[#allocation53_spill]]  ;;  %s3580_s9 = smov [#allocation17]  }
  0x42   :  { %s146_s0 = sshll.u32 %s3580_s9, 4  ;;  %s3581_s6 = smov [#allocation20]   ;;  %s147_s0 = int_to_ptr.vmem [resolvable:$true] %s146_s0 }
  0x43   :  { %s170_s25 = sshll.u32 %s3581_s6, 4  ;;  %s3240_s3 = scalar_lea.vmem %s147_s0, 256  ;;  %s171_s25 = int_to_ptr.vmem [resolvable:$true] %s170_s25 }
  0x44   :  { %p3241_p6 = scmp.ne.s32.totalorder %s147_s0, %s3240_s3  ;;  %p3245_p7 = scmp.lt.s32.totalorder %s147_s0, %s147_s0 }
  0x45   :  { %p3246_p8 = scmp.lt.s32.totalorder %s3240_s3, %s3240_s3 }
  0x47   :  { %128 = dma.hbm_to_vmem [thread:$0]  %s4214_s28, 16, %s126_s29, [#allocation15]  }
  0x48   :  { %p3247_p9 = por %p3246_p8, %p3245_p7 }
  0x4a   :  { %p3248_p10 = pnand %p3247_p9, %p3241_p6 }
  0x4c   :  { %3251 = shalt.err (!%p3248_p10)
}
  0x4d   :  { %152 = dma.hbm_to_vmem [thread:$0]  %s4184_s12, 256, %s147_s0, [#allocation18], %s3578_s2, %s3578_s2, %s3579_s7  }
  0x4e   :  { %s3260_s29 = scalar_lea.vmem %s171_s25, 256  ;;  %p3265_p12 = scmp.lt.s32.totalorder %s171_s25, %s171_s25 }
  0x4f   :  { %p3261_p11 = scmp.ne.s32.totalorder %s171_s25, %s3260_s29  ;;  %p3266_p13 = scmp.lt.s32.totalorder %s3260_s29, %s3260_s29 }
  0x51   :  { %p3267_p0 = por %p3266_p13, %p3265_p12 }
  0x53   :  { %p3268_p1 = pnand %p3267_p0, %p3261_p11 }
  0x55   :  { %3271 = shalt.err (!%p3268_p1)
}
  0x56   :  { %176 = dma.hbm_to_vmem [thread:$0]  %s4187_s15, 256, %s171_s25, [#allocation21], %s3578_s2, %s3578_s2, %s3579_s7  }
  0x57   :  { %s3582_s8 = smov [#allocation23]   ;;  %s3583_s4 = smov [#allocation26]  }
  0x58   :  { %s195_s27 = sshll.u32 %s3582_s8, 4  ;;  %s214_s28 = sshll.u32 %s3583_s4, 4  ;;  %s196_s27 = int_to_ptr.vmem [resolvable:$true] %s195_s27  ;;  %s215_s28 = int_to_ptr.vmem [resolvable:$true] %s214_s28 }
  0x59   :  { %s3280_s12 = scalar_lea.vmem %s196_s27, 16  ;;  %s3284_s9 = scalar_lea.vmem %s196_s27, 32 }
  0x5a   :  { %p3281_p2 = scmp.ne.s32.totalorder %s196_s27, %s3280_s12  ;;  %p3285_p3 = scmp.lt.s32.totalorder %s196_s27, %s196_s27 }
  0x5b   :  { %p3286_p4 = scmp.lt.s32.totalorder %s3284_s9, %s3280_s12 }
  0x5d   :  { %p3287_p5 = por %p3286_p4, %p3285_p3 }
  0x5f   :  { %p3288_p6 = pnand %p3287_p5, %p3281_p2 }
  0x61   :  { %3291 = shalt.err (!%p3288_p6)
}
  0x62   :  { %198 = dma.hbm_to_vmem [thread:$0]  %s4189_s17, 16, %s196_s27, [#allocation24]  }
  0x63   :  { %s3300_s3 = scalar_lea.vmem %s215_s28, 256  ;;  %p3305_p8 = scmp.lt.s32.totalorder %s215_s28, %s215_s28 }
  0x64   :  { %p3301_p7 = scmp.ne.s32.totalorder %s215_s28, %s3300_s3  ;;  %p3306_p9 = scmp.lt.s32.totalorder %s3300_s3, %s3300_s3 }
  0x66   :  { %p3307_p10 = por %p3306_p9, %p3305_p8 }
  0x68   :  { %p3308_p11 = pnand %p3307_p10, %p3301_p7 }
  0x6a   :  { %3311 = shalt.err (!%p3308_p11)
}
  0x6b   :  { %220 = dma.hbm_to_vmem [thread:$0]  %s4191_s19, 256, %s215_s28, [#allocation27], %s3578_s2, %s3578_s2, %s3579_s7  }
  0x6c   :  { %s3584_s5 = smov [#allocation29]   ;;  %s3585_s29 = smov [#allocation2]  }
  0x6d   :  { %s238_s30 = sshll.u32 %s3584_s5, 4  ;;  %s47_s26 = sshll.u32 %s3585_s29, 4  ;;  %s239_s30 = int_to_ptr.vmem [resolvable:$true] %s238_s30  ;;  %s48_s26 = int_to_ptr.vmem [resolvable:$true] %s47_s26 }
  0x6e   :  { %s3320_s17 = scalar_lea.vmem %s239_s30, 256  ;;  %p3325_p13 = scmp.lt.s32.totalorder %s239_s30, %s239_s30 }
  0x6f   :  { %p3321_p12 = scmp.ne.s32.totalorder %s239_s30, %s3320_s17  ;;  %p3326_p0 = scmp.lt.s32.totalorder %s3320_s17, %s3320_s17 }
  0x71   :  { %p3327_p1 = por %p3326_p0, %p3325_p13 }
  0x73   :  { %p3328_p2 = pnand %p3327_p1, %p3321_p12 }
  0x75   :  { %3331 = shalt.err (!%p3328_p2)
}
  0x76   :  { %244 = dma.hbm_to_vmem [thread:$0]  %s4193_s21, 256, %s239_s30, [#allocation30], %s3578_s2, %s3578_s2, %s3579_s7  }
  0x77   :  { %s3340_s19 = scalar_lea.vmem %s48_s26, 128  ;;  %p3345_p4 = scmp.lt.s32.totalorder %s48_s26, %s48_s26 }
  0x78   :  { %p3341_p3 = scmp.ne.s32.totalorder %s48_s26, %s3340_s19  ;;  %p3346_p5 = scmp.lt.s32.totalorder %s3340_s19, %s3340_s19 }
  0x7a   :  { %p3347_p6 = por %p3346_p5, %p3345_p4 }
  0x7c   :  { %p3348_p7 = pnand %p3347_p6, %p3341_p3 }
  0x7e   :  { %3351 = shalt.err (!%p3348_p7)
}
  0x7f   :  { %s4215_s28 = sld [smem:[#allocation44_spill]]  ;;  %s3586_s12 = smov [#allocation7]  }
  0x80   :  { %s67_s9 = sshll.u32 %s3586_s12, 4  ;;  %s3587_s0 = smov [#allocation10]   ;;  %s68_s9 = int_to_ptr.vmem [resolvable:$true] %s67_s9 }
  0x81   :  { %s86_s6 = sshll.u32 %s3587_s0, 4  ;;  %s3360_s3 = scalar_lea.vmem %s68_s9, 128  ;;  %s87_s6 = int_to_ptr.vmem [resolvable:$true] %s86_s6 }
  0x82   :  { %p3361_p8 = scmp.ne.s32.totalorder %s68_s9, %s3360_s3  ;;  %p3365_p9 = scmp.lt.s32.totalorder %s68_s9, %s68_s9 }
  0x83   :  { %p3366_p10 = scmp.lt.s32.totalorder %s3360_s3, %s3360_s3 }
  0x85   :  { %50 = dma.hbm_to_vmem [thread:$0]  %s4215_s28, 128, %s48_s26, [#allocation3]  }
  0x86   :  { %p3367_p11 = por %p3366_p10, %p3365_p9 }
  0x88   :  { %p3368_p12 = pnand %p3367_p11, %p3361_p8 }
  0x8a   :  { %3371 = shalt.err (!%p3368_p12)
}
  0x8b   :  { %s4216_s25 = sld [smem:[#allocation46_spill]]  ;;  %s3380_s5 = scalar_lea.vmem %s87_s6, 1024 }
  0x8c   :  { %p3381_p13 = scmp.ne.s32.totalorder %s87_s6, %s3380_s5  ;;  %p3385_p0 = scmp.lt.s32.totalorder %s87_s6, %s87_s6 }
  0x8d   :  { %p3386_p1 = scmp.lt.s32.totalorder %s3380_s5, %s3380_s5 }
  0x8f   :  { %p3387_p2 = por %p3386_p1, %p3385_p0 }
  0x91   :  { %70 = dma.hbm_to_vmem [thread:$0]  %s4216_s25, 128, %s68_s9, [#allocation6]  }
  0x92   :  { %p3388_p3 = pnand %p3387_p2, %p3381_p13 }
  0x94   :  { %3391 = shalt.err (!%p3388_p3)
}
  0x95   :  { %s4217_s26 = sld [smem:[#allocation48_spill]]  ;;  %s3588_s17 = smov [#allocation13]  }
  0x96   :  { %s115_s1 = sshll.u32 %s3588_s17, 4  ;;  %s3589_s8 = smov [#allocation16]   ;;  %s116_s1 = int_to_ptr.vmem [resolvable:$true] %s115_s1 }
  0x97   :  { %s135_s19 = sshll.u32 %s3589_s8, 4  ;;  %s3400_s27 = scalar_lea.vmem %s116_s1, 16  ;;  %s136_s19 = int_to_ptr.vmem [resolvable:$true] %s135_s19 }
  0x98   :  { %p3401_p4 = scmp.ne.s32.totalorder %s116_s1, %s3400_s27  ;;  %s3404_s4 = scalar_lea.vmem %s116_s1, 32 }
  0x99   :  { %p3405_p5 = scmp.lt.s32.totalorder %s116_s1, %s116_s1  ;;  %p3406_p6 = scmp.lt.s32.totalorder %s3404_s4, %s3400_s27 }
  0x9b   :  { %92 = dma.hbm_to_vmem [thread:$0]  %s4217_s26, 1024, %s87_s6, [#allocation9], %s3578_s2, %s3578_s2, %s3579_s7  }
  0x9c   :  { %p3407_p7 = por %p3406_p6, %p3405_p5 }
  0x9e   :  { %p3408_p8 = pnand %p3407_p7, %p3401_p4 }
  0xa0   :  { %3411 = shalt.err (!%p3408_p8)
}
  0xa1   :  { %s4218_s9 = sld [smem:[#allocation52_spill]]  ;;  %s3420_s0 = scalar_lea.vmem %s136_s19, 128 }
  0xa2   :  { %p3421_p9 = scmp.ne.s32.totalorder %s136_s19, %s3420_s0  ;;  %p3425_p10 = scmp.lt.s32.totalorder %s136_s19, %s136_s19 }
  0xa3   :  { %p3426_p11 = scmp.lt.s32.totalorder %s3420_s0, %s3420_s0 }
  0xa5   :  { %p3427_p12 = por %p3426_p11, %p3425_p10 }
  0xa7   :  { %118 = dma.hbm_to_vmem [thread:$0]  %s4218_s9, 16, %s116_s1, [#allocation12]  }
  0xa8   :  { %p3428_p13 = pnand %p3427_p12, %p3421_p9 }
  0xaa   :  { %3431 = shalt.err (!%p3428_p13)
}
  0xab   :  { %138 = dma.hbm_to_vmem [thread:$0]  %s4182_s10, 128, %s136_s19, [#allocation15]  }
  0xac   :  { %s3590_s21 = smov [#allocation19]   ;;  %s3591_s25 = smov [#allocation22]  }
  0xad   :  { %s159_s15 = sshll.u32 %s3590_s21, 4  ;;  %s182_s5 = sshll.u32 %s3591_s25, 4  ;;  %s160_s15 = int_to_ptr.vmem [resolvable:$true] %s159_s15  ;;  %s183_s5 = int_to_ptr.vmem [resolvable:$true] %s182_s5 }
  0xae   :  { %s3440_s30 = scalar_lea.vmem %s160_s15, 16  ;;  %s3444_s29 = scalar_lea.vmem %s160_s15, 32 }
  0xaf   :  { %p3441_p0 = scmp.ne.s32.totalorder %s160_s15, %s3440_s30  ;;  %p3445_p1 = scmp.lt.s32.totalorder %s160_s15, %s160_s15 }
  0xb0   :  { %p3446_p2 = scmp.lt.s32.totalorder %s3444_s29, %s3440_s30 }
  0xb2   :  { %p3447_p3 = por %p3446_p2, %p3445_p1 }
  0xb4   :  { %p3448_p4 = pnand %p3447_p3, %p3441_p0 }
  0xb6   :  { %3451 = shalt.err (!%p3448_p4)
}
  0xb7   :  { %162 = dma.hbm_to_vmem [thread:$0]  %s4185_s13, 16, %s160_s15, [#allocation18]  }
  0xb8   :  { %s3460_s1 = scalar_lea.vmem %s183_s5, 256  ;;  %p3465_p6 = scmp.lt.s32.totalorder %s183_s5, %s183_s5 }
  0xb9   :  { %p3461_p5 = scmp.ne.s32.totalorder %s183_s5, %s3460_s1  ;;  %p3466_p7 = scmp.lt.s32.totalorder %s3460_s1, %s3460_s1 }
  0xbb   :  { %p3467_p8 = por %p3466_p7, %p3465_p6 }
  0xbd   :  { %p3468_p9 = pnand %p3467_p8, %p3461_p5 }
  0xbf   :  { %3471 = shalt.err (!%p3468_p9)
}
  0xc0   :  { %188 = dma.hbm_to_vmem [thread:$0]  %s4188_s16, 256, %s183_s5, [#allocation21], %s3578_s2, %s3578_s2, %s3579_s7  }
  0xc1   :  { %s3592_s19 = smov [#allocation25]   ;;  %s3593_s4 = smov [#allocation28]  }
  0xc2   :  { %s205_s27 = sshll.u32 %s3592_s19, 4  ;;  %s226_s28 = sshll.u32 %s3593_s4, 4  ;;  %s206_s27 = int_to_ptr.vmem [resolvable:$true] %s205_s27  ;;  %s227_s28 = int_to_ptr.vmem [resolvable:$true] %s226_s28 }
  0xc3   :  { %s3480_s13 = scalar_lea.vmem %s206_s27, 128  ;;  %p3485_p11 = scmp.lt.s32.totalorder %s206_s27, %s206_s27 }
  0xc4   :  { %p3481_p10 = scmp.ne.s32.totalorder %s206_s27, %s3480_s13  ;;  %p3486_p12 = scmp.lt.s32.totalorder %s3480_s13, %s3480_s13 }
  0xc6   :  { %p3487_p13 = por %p3486_p12, %p3485_p11 }
  0xc8   :  { %p3488_p0 = pnand %p3487_p13, %p3481_p10 }
  0xca   :  { %3491 = shalt.err (!%p3488_p0)
}
  0xcb   :  { %208 = dma.hbm_to_vmem [thread:$0]  %s4190_s18, 128, %s206_s27, [#allocation24]  }
  0xcc   :  { %s3500_s0 = scalar_lea.vmem %s227_s28, 256  ;;  %p3505_p2 = scmp.lt.s32.totalorder %s227_s28, %s227_s28 }
  0xcd   :  { %p3501_p1 = scmp.ne.s32.totalorder %s227_s28, %s3500_s0  ;;  %p3506_p3 = scmp.lt.s32.totalorder %s3500_s0, %s3500_s0 }
  0xcf   :  { %p3507_p4 = por %p3506_p3, %p3505_p2 }
  0xd1   :  { %p3508_p5 = pnand %p3507_p4, %p3501_p1 }
  0xd3   :  { %3511 = shalt.err (!%p3508_p5)
}
  0xd4   :  { %232 = dma.hbm_to_vmem [thread:$0]  %s4192_s20, 256, %s227_s28, [#allocation27], %s3578_s2, %s3578_s2, %s3579_s7  }
  0xd5   :  { %s3594_s3 = smov [#allocation31]  }
  0xd6   :  { %s253_s21 = sshll.u32 %s3594_s3, 4  ;;  %s254_s21 = int_to_ptr.vmem [resolvable:$true] %s253_s21 }
  0xd7   :  { %s3520_s15 = scalar_lea.vmem %s254_s21, 128  ;;  %p3525_p7 = scmp.lt.s32.totalorder %s254_s21, %s254_s21 }
  0xd8   :  { %p3521_p6 = scmp.ne.s32.totalorder %s254_s21, %s3520_s15  ;;  %p3526_p8 = scmp.lt.s32.totalorder %s3520_s15, %s3520_s15 }
  0xda   :  { %p3527_p9 = por %p3526_p8, %p3525_p7 }
  0xdc   :  { %p3528_p10 = pnand %p3527_p9, %p3521_p6 }
  0xde   :  { %3531 = shalt.err (!%p3528_p10)
}
  0xdf   :  { %256 = dma.hbm_to_vmem [thread:$0]  %s4195_s23, 128, %s254_s21, [#allocation30]  }
  0xe0   :  { %3552 = dma.done.wait [#allocation3], 128  }
  0xe1   :  { %3553 = vsyncadd [#allocation3], 4294967168 }
  0xe2   :  { %3554 = dma.done.wait [#allocation6], 256  }
  0xe3   :  { %3555 = vsyncadd [#allocation6], 4294967040 }
  0xe4   :  { %3556 = dma.done.wait [#allocation9], 1152  }
  0xe5   :  { %3557 = vsyncadd [#allocation9], 4294966144 }
  0xe6   :  { %3558 = dma.done.wait [#allocation12], 1040  }
  0xe7   :  { %3559 = vsyncadd [#allocation12], 4294966256 }
  0xe8   :  { %3560 = dma.done.wait [#allocation15], 144  }
  0xe9   :  { %3561 = vsyncadd [#allocation15], 4294967152 }
  0xea   :  { %3562 = dma.done.wait [#allocation18], 272  }
  0xeb   :  { %3563 = vsyncadd [#allocation18], 4294967024 }
  0xec   :  { %3564 = dma.done.wait [#allocation21], 512  }
  0xed   :  { %3565 = vsyncadd [#allocation21], 4294966784 }
  0xee   :  { %3566 = dma.done.wait [#allocation24], 144  }
  0xef   :  { %3567 = vsyncadd [#allocation24], 4294967152 }
  0xf0   :  { %3568 = dma.done.wait [#allocation27], 512  }
  0xf1   :  { %3569 = vsyncadd [#allocation27], 4294966784 }
  0xf2   :  { %3570 = dma.done.wait [#allocation30], 384  }
  0xf3   :  { %3571 = vsyncadd [#allocation30], 4294966912  ;;  %v3595_v0 = vmov 0.0   ;;  %vm3596_vm0 = vmmov 0   ;;  %s4219_s2 = sld [smem:[#allocation51_spill]]  ;;  %v3827_v3 = vld [vmem:[#allocation5] sm:$0xff]  ;;  %v324_v4 = vlaneseq }
  0xf4   :  { %2910 = vmatprep.subr.mxu1 %v3595_v0  ;;  %2914 = vmatprep.mubr.msk.f32.mxu1 %vm3596_vm0, %v3595_v0  ;;  %vm320_vm1 = vcmask 130048   ;;  %v3597_v5 = vmov 1966171168   ;;  %v496_v18 = vld [vmem:[#allocation11] sm:$0xff]  ;;  %v497_v23 = vld [vmem:[#allocation11 + $0x8] sm:$0xff]  ;;  %v498_v25 = vld [vmem:[#allocation11 + $0x10] sm:$0xff] }
  0xf5   :  { %2903 = vmatprep.subr.mxu0 %v3595_v0  ;;  %2907 = vmatprep.mubr.msk.f32.mxu0 %vm3596_vm0, %v3595_v0  ;;  %v507_v6 = vunpack.c.l.s4 %v3597_v5  ;;  %v3836_v8 = vshrl.u32 %v324_v4, 7  ;;  %v500_v26 = vld [vmem:[#allocation11 + $0x20] sm:$0xff]  ;;  %v499_v32 = vld [vmem:[#allocation11 + $0x18] sm:$0xff]  ;;  %v501_v33 = vld [vmem:[#allocation11 + $0x28] sm:$0xff]  ;;  %vm704_vm2 = vcmask 1041409   ;;  %vm706_vm3 = vcmask 1042434  }
  0xf6   :  { %v2811_v31 = vld [vmem:[#allocation13] ss:$0 sm:$0xff]  ;;  %v502_v37 = vld [vmem:[#allocation11 + $0x30] sm:$0xff]  ;;  %v503_v49 = vld [vmem:[#allocation11 + $0x38] sm:$0xff]  ;;  %vm708_vm4 = vcmask 1043459   ;;  %vm710_vm5 = vcmask 1044484  }
  0xf7   :  { %v508_v7 = vunpack.c.0.s8 %v507_v6  ;;  %v3840_v13 = vsub.s32 0, %v3836_v8  ;;  %v2812_v59 = vld [vmem:[#allocation14] ss:$0 sm:$0xff]  ;;  %vm712_vm6 = vcmask 1045509   ;;  %vm714_vm7 = vcmask 1046534   ;;  %s4220_s26 = sld [smem:[#allocation50_spill]] }
  0xf8   :  { %vm716_vm8 = vcmask 1047559   ;;  %vm719_vm9 = vcmask 64512   ;;  %s3599_s4 = smov 16   ;;  %s3601_s9 = smov 96   ;;  %vm2777_vm13 = vcmask 261120   ;;  %vm2779_vm14 = vcmask 392192  }
  0xf9   :  { %v422_v1 = vld [vmem:[%s4219_s2 + $0x8] sm:$0xff]  ;;  %v421_v2 = vld [vmem:[%s4219_s2] sm:$0xff]  ;;  %v511_v9 = vsub.s32 %v508_v7, %v3836_v8  ;;  %s3603_s18 = smov [#allocation32]   ;;  %vm2781_vm15 = vcmask 523264  }
  0xfa   :  { %2911 = vmatpush3.msra.mxu1 %v422_v1  ;;  %s2790_s25 = sshll.u32 %s3603_s18, 4  ;;  %s2791_s25 = int_to_ptr.vmem [resolvable:$true] %s2790_s25 }
  0xfb   :  { %2912 = vmatprep.subr.mxu1 %v3595_v0  ;;  %s3532_s20 = scalar_lea.vmem %s2791_s25, 128  ;;  %p3537_p12 = scmp.lt.s32.totalorder %s2791_s25, %s2791_s25 }
  0xfc   :  { %2913 = vmatpush3.msra.mxu1 %v421_v2  ;;  %p3533_p11 = scmp.ne.s32.totalorder %s2791_s25, %s3532_s20  ;;  %p3538_p13 = scmp.lt.s32.totalorder %s3532_s20, %s3532_s20 }
  0xfd   :  { %2915 = vmatmul.mubr.msk.f32.vlgmr.msra.gmra.mxu1 %vm320_vm1, %v3827_v3  ;;  %2922 = vmatprep.subr.mxu1 %v3595_v0 }
  0xfe   :  { %2924 = vmatprep.mubr.msk.f32.mxu1 %vm3596_vm0, %v3595_v0  ;;  %p3539_p0 = por %p3538_p13, %p3537_p12 }
 0x100   :  { %p3540_p1 = pnand %p3539_p0, %p3533_p11 }
 0x1bd   :  { %v492_v10 = vpop.f32.mrf.mxu1 }
 0x1be   :  { %v505_v11 = vcombine.high %v492_v10, %v492_v10  ;;  %v512_v12 = vrot.slane %v492_v10, %v511_v9 }
 0x1bf   :  { %v2916_v14 = vpop.f32.mrf.mxu1 }
 0x1c0   :  { %v519_v15 = vrot.slane %v505_v11, %v511_v9  ;;  %v520_v16 = vcombine.high %v512_v12, %v512_v12  ;;  %v528_v17 = vrot.slane %v512_v12, %v511_v9 }
 0x1c2   :  { %v521_v19 = vcombine.high %v519_v15, %v519_v15  ;;  %v535_v20 = vrot.slane %v519_v15, %v511_v9  ;;  %v542_v21 = vrot.slane %v520_v16, %v511_v9  ;;  %v550_v22 = vcombine.high %v528_v17, %v528_v17 }
 0x1c3   :  { %v557_v24 = vrot.slane %v528_v17, %v3840_v13 }
 0x1c4   :  { %v549_v27 = vrot.slane %v521_v19, %v511_v9  ;;  %v551_v28 = vcombine.high %v535_v20, %v535_v20  ;;  %v552_v29 = vcombine.high %v542_v21, %v542_v21  ;;  %v561_v30 = vrot.slane %v542_v21, %v3840_v13 }
 0x1c5   :  { %v565_v34 = vrot.slane %v550_v22, %v3840_v13  ;;  %v573_v35 = vrot.slane %v535_v20, %v3840_v13  ;;  %v594_v36 = vadd.f32 %v557_v24, %v496_v18 }
 0x1c6   :  { %v553_v38 = vcombine.high %v549_v27, %v549_v27  ;;  %v569_v39 = vrot.slane %v552_v29, %v3840_v13  ;;  %v577_v40 = vrot.slane %v549_v27, %v3840_v13  ;;  %v581_v41 = vrot.slane %v551_v28, %v3840_v13 }
 0x1c7   :  { %v595_v42 = vadd.f32 %v561_v30, %v497_v23  ;;  %v596_v43 = vadd.f32 %v565_v34, %v498_v25  ;;  %v598_v44 = vadd.f32 %v573_v35, %v500_v26  ;;  %v609_v45 = vadd.f32 %v2811_v31, %v594_v36  ;;  %v3858_v25 = vld [vmem:[#allocation2] sm:$0xff] }
 0x1c8   :  { %v585_v46 = vrot.slane %v553_v38, %v3840_v13  ;;  %v597_v47 = vadd.f32 %v569_v39, %v499_v32  ;;  %v599_v48 = vadd.f32 %v577_v40, %v501_v33  ;;  %v600_v50 = vadd.f32 %v581_v41, %v502_v37 }
 0x1c9   :  { %v610_v51 = vadd.f32 %v2811_v31, %v595_v42  ;;  %v611_v52 = vadd.f32 %v2811_v31, %v596_v43  ;;  %3088 = vtanh.f32 %v609_v45  ;;  %v613_v54 = vadd.f32 %v2811_v31, %v598_v44 }
 0x1ca   :  { %v612_v53 = vadd.f32 %v2811_v31, %v597_v47  ;;  %v601_v55 = vadd.f32 %v585_v46, %v503_v49  ;;  %v614_v56 = vadd.f32 %v2811_v31, %v599_v48  ;;  %v615_v57 = vadd.f32 %v2811_v31, %v600_v50 }
 0x1cb   :  { %3090 = vtanh.f32 %v610_v51  ;;  %v321_v26 = vsel %vm320_vm1, %v3858_v25, -inf  ;;  %v3863_v27 = vand.u32 127, %v324_v4 }
 0x1cc   :  { %3092 = vtanh.f32 %v611_v52  ;;  %v616_v58 = vadd.f32 %v2811_v31, %v601_v55  ;;  %v3598_v52 = vmov 0   ;;  %v738_v55 = vsub.s32 3, %v3836_v8 }
 0x1cd   :  { %3094 = vtanh.f32 %v612_v53  ;;  %v3867_v29 = vsub.s32 %v3863_v27, %v3836_v8  ;;  %3087 = vset.pattern.permute.xlu1 %v3598_v52  ;;  %3086 = vset.pattern.permute.xlu0 %v3598_v52  ;;  %v730_v53 = vsub.s32 1, %v3836_v8 }
 0x1ce   :  { %3096 = vtanh.f32 %v613_v54  ;;  %v734_v54 = vsub.s32 2, %v3836_v8 }
 0x1cf   :  { %3098 = vtanh.f32 %v614_v56 }
 0x1d0   :  { %3100 = vtanh.f32 %v615_v57 }
 0x1d1   :  { %3102 = vtanh.f32 %v616_v58 }
 0x1d6   :  { %v3089_v60 = vpop.eup %3088 }
 0x1d7   :  { %v632_v61 = vmul.f32 %v3089_v60, %v2812_v59 }
 0x1d8   :  { %v3091_v62 = vpop.eup %3090 }
 0x1d9   :  { %v3093_v63 = vpop.eup %3092  ;;  %v640_v1 = vsel %vm320_vm1, %v632_v61, 0.0  ;;  %v633_v2 = vmul.f32 %v3091_v62, %v2812_v59  ;;  %v742_v62 = vsub.s32 4, %v3836_v8 }
 0x1da   :  { %v3095_v5 = vpop.eup %3094  ;;  %641 = vadd.xlane.f32.xlu0 %v640_v1  ;;  %v634_v6 = vmul.f32 %v3093_v63, %v2812_v59 }
 0x1db   :  { %v3097_v7 = vpop.eup %3096  ;;  %v635_v10 = vmul.f32 %v3095_v5, %v2812_v59  ;;  %v643_v12 = vsel %vm320_vm1, %v633_v2, 0.0 }
 0x1dc   :  { %v646_v9 = vsel %vm320_vm1, %v634_v6, 0.0  ;;  %v3099_v11 = vpop.eup %3098  ;;  %v636_v14 = vmul.f32 %v3097_v7, %v2812_v59  ;;  %v746_v6 = vsub.s32 5, %v3836_v8 }
 0x1dd   :  { %647 = vadd.xlane.f32.xlu1 %v646_v9  ;;  %v3101_v15 = vpop.eup %3100  ;;  %v649_v16 = vsel %vm320_vm1, %v635_v10, 0.0  ;;  %v637_v17 = vmul.f32 %v3099_v11, %v2812_v59  ;;  %v750_v11 = vsub.s32 6, %v3836_v8 }
 0x1de   :  { %644 = vadd.xlane.f32.xlu0 %v643_v12  ;;  %v3103_v18 = vpop.eup %3102  ;;  %v652_v19 = vsel %vm320_vm1, %v636_v14, 0.0  ;;  %v638_v20 = vmul.f32 %v3101_v15, %v2812_v59 }
 0x1df   :  { %v655_v21 = vsel %vm320_vm1, %v637_v17, 0.0  ;;  %v639_v22 = vmul.f32 %v3103_v18, %v2812_v59 }
 0x1e0   :  { %v658_v23 = vsel %vm320_vm1, %v638_v20, 0.0 }
 0x1e1   :  { %650 = vadd.xlane.f32.xlu1 %v649_v16  ;;  %v661_v24 = vsel %vm320_vm1, %v639_v22, 0.0  ;;  %v754_v16 = vsub.s32 7, %v3836_v8 }
 0x1e2   :  { %653 = vadd.xlane.f32.xlu0 %v652_v19 }
 0x1e5   :  { %656 = vadd.xlane.f32.xlu1 %v655_v21 }
 0x1e6   :  { %659 = vadd.xlane.f32.xlu0 %v658_v23 }
 0x1e9   :  { %662 = vadd.xlane.f32.xlu1 %v661_v24 }
 0x1ed   :  { %322 = vmax.xlane.f32.xlu1 %v321_v26 }
 0x263   :  { %v642_v28 = vpop.xlane.xlu0 %641 }
 0x264   :  { %v675_v32 = vrot.slane %v642_v28, %v3867_v29 }
 0x266   :  { %v648_v30 = vpop.xlane.xlu1 %647 }
 0x267   :  { %v645_v31 = vpop.xlane.xlu0 %644  ;;  %v683_v34 = vrot.slane %v648_v30, %v3867_v29 }
 0x268   :  { %v679_v33 = vrot.slane %v645_v31, %v3867_v29 }
 0x26a   :  { %v705_v35 = vsel %vm704_vm2, %v679_v33, %v675_v32  ;;  %v651_v4 = vpop.xlane.xlu1 %650 }
 0x26b   :  { %v707_v36 = vsel %vm706_vm3, %v683_v34, %v705_v35  ;;  %v687_v37 = vrot.slane %v651_v4, %v3867_v29  ;;  %v654_v38 = vpop.xlane.xlu0 %653 }
 0x26c   :  { %v691_v39 = vrot.slane %v654_v38, %v3867_v29 }
 0x26d   :  { %v709_v40 = vsel %vm708_vm4, %v687_v37, %v707_v36 }
 0x26e   :  { %v711_v41 = vsel %vm710_vm5, %v691_v39, %v709_v40  ;;  %v657_v42 = vpop.xlane.xlu1 %656 }
 0x26f   :  { %v695_v43 = vrot.slane %v657_v42, %v3867_v29  ;;  %v660_v44 = vpop.xlane.xlu0 %659 }
 0x270   :  { %v699_v45 = vrot.slane %v660_v44, %v3867_v29 }
 0x271   :  { %v713_v46 = vsel %vm712_vm6, %v695_v43, %v711_v41 }
 0x272   :  { %v663_v47 = vpop.xlane.xlu1 %662  ;;  %v715_v48 = vsel %vm714_vm7, %v699_v45, %v713_v46 }
 0x273   :  { %v703_v49 = vrot.slane %v663_v47, %v3867_v29 }
 0x275   :  { %v717_v50 = vsel %vm716_vm8, %v703_v49, %v715_v48 }
 0x276   :  { %v720_v51 = vsel %vm719_vm9, %v717_v50, -inf  ;;  %v323_v33 = vpop.xlane.xlu1 %322 }
 0x277   :  { %721 = vmax.xlane.f32.xlu0 %v720_v51  ;;  %vm326_vm10 = vcmp.eq.f32.partialorder %v3858_v25, %v323_v33 }
 0x300   :  { %v722_v56 = vpop.xlane.xlu0 %721 }
 0x301   :  { %v727_v57 = vrot.slane %v722_v56, %v3840_v13  ;;  %v731_v58 = vrot.slane %v722_v56, %v730_v53  ;;  %v735_v59 = vrot.slane %v722_v56, %v734_v54  ;;  %v739_v63 = vrot.slane %v722_v56, %v738_v55 }
 0x302   :  { %v743_v7 = vrot.slane %v722_v56, %v742_v62  ;;  %v747_v12 = vrot.slane %v722_v56, %v746_v6  ;;  %v751_v17 = vrot.slane %v722_v56, %v750_v11  ;;  %v755_v21 = vrot.slane %v722_v56, %v754_v16 }
 0x303   :  { %v764_v60 = vsub.f32 %v642_v28, %v727_v57  ;;  %v765_v61 = vsub.f32 %v645_v31, %v731_v58  ;;  %v766_v1 = vsub.f32 %v648_v30, %v735_v59  ;;  %v767_v9 = vsub.f32 %v651_v4, %v739_v63 }
 0x304   :  { %v768_v14 = vsub.f32 %v654_v38, %v743_v7  ;;  %v769_v18 = vsub.f32 %v657_v42, %v747_v12  ;;  %v770_v22 = vsub.f32 %v660_v44, %v751_v17  ;;  %v771_v26 = vsub.f32 %v663_v47, %v755_v21  ;;  %v346_v17 = vld [vmem:[%s4220_s26] sm:$0xff] }
 0x305   :  { %v772_v2 = vmul.f32 1.442695, %v764_v60  ;;  %v774_v5 = vmul.f32 1.442695, %v765_v61  ;;  %v776_v10 = vmul.f32 1.442695, %v766_v1 }
 0x306   :  { %v778_v15 = vmul.f32 1.442695, %v767_v9  ;;  %v780_v19 = vmul.f32 1.442695, %v768_v14  ;;  %v782_v23 = vmul.f32 1.442695, %v769_v18 }
 0x307   :  { %3104 = vpow2.f32 %v772_v2  ;;  %v784_v28 = vmul.f32 1.442695, %v770_v22  ;;  %v786_v31 = vmul.f32 1.442695, %v771_v26  ;;  %v327_v4 = vsel %vm326_vm10, %v3863_v27, 16 }
 0x308   :  { %3106 = vpow2.f32 %v774_v5  ;;  %v328_v37 = vsel %vm320_vm1, %v327_v4, 2147483647 }
 0x309   :  { %3108 = vpow2.f32 %v776_v10  ;;  %v330_v38 = vshra.s32 %v328_v37, 16  ;;  %v329_v9 = vand.u32 65535, %v328_v37 }
 0x30a   :  { %3110 = vpow2.f32 %v778_v15  ;;  %v347_v15 = vld [vmem:[%s4220_s26 + $0x8] sm:$0xff] }
 0x30b   :  { %3112 = vpow2.f32 %v780_v19  ;;  %v332_v40 = vcvt.s32.f32 %v330_v38  ;;  %v331_v12 = vcvt.s32.f32 %v329_v9  ;;  %2904 = vmatpush3.msra.mxu0 %v347_v15  ;;  %v1568_v9 = vld [vmem:[#allocation16] sm:$0xff] }
 0x30c   :  { %3114 = vpow2.f32 %v782_v23  ;;  %2905 = vmatprep.subr.mxu0 %v3595_v0  ;;  %v1569_v15 = vld [vmem:[%s4183_s11] sm:$0xff] }
 0x30d   :  { %3116 = vpow2.f32 %v784_v28  ;;  %2906 = vmatpush3.msra.mxu0 %v346_v17  ;;  %v1823_v17 = vld [vmem:[#allocation26] sm:$0xff] }
 0x30e   :  { %3118 = vpow2.f32 %v786_v31  ;;  %2917 = vmatprep.subr.mxu0 %v3595_v0  ;;  %v921_v31 = vld [vmem:[#allocation10 + $0x8] sm:$0xff] }
 0x30f   :  { %2923 = vmatpush3.msra.mxu1 %v921_v31 }
 0x310   :  { %2932 = vmatprep.subr.mxu1 %v3595_v0 }
 0x314   :  { %v3905_v20 = vpop.eup %3104 }
 0x315   :  { %v3909_v24 = vpop.eup %3106  ;;  %797 = vperm.xlu0 %3086, %v3905_v20  }
 0x316   :  { %800 = vperm.xlu1 %3087, %v3909_v24   ;;  %v3913_v30 = vpop.eup %3108 }
 0x317   :  { %v3916_v32 = vpop.eup %3110 }
 0x318   :  { %v3919_v34 = vpop.eup %3112 }
 0x319   :  { %v3923_v35 = vpop.eup %3114 }
 0x31a   :  { %803 = vperm.xlu1 %3087, %v3913_v30   ;;  %v3927_v36 = vpop.eup %3116 }
 0x31b   :  { %v3931_v39 = vpop.eup %3118 }
 0x31e   :  { %806 = vperm.xlu1 %3087, %v3916_v32  }
 0x322   :  { %809 = vperm.xlu1 %3087, %v3919_v34  }
 0x326   :  { %812 = vperm.xlu1 %3087, %v3923_v35  }
 0x32a   :  { %815 = vperm.xlu1 %3087, %v3927_v36  }
 0x32e   :  { %818 = vperm.xlu1 %3087, %v3931_v39  }
 0x334   :  { %333 = vmin.xlane.f32.xlu0 %v332_v40 }
 0x390   :  { %v798_v44 = vpop.permute.xlu0 %797 }
 0x391   :  { %v801_v25 = vpop.permute.xlu1 %800  ;;  %v823_v46 = vrot.slane %v798_v44, %v3867_v29 }
 0x392   :  { %v827_v47 = vrot.slane %v801_v25, %v3867_v29 }
 0x394   :  { %v852_v52 = vsel %vm704_vm2, %v827_v47, %v823_v46  ;;  %v923_v47 = vld [vmem:[#allocation10 + $0x18] sm:$0xff] }
 0x395   :  { %v804_v41 = vpop.permute.xlu1 %803 }
 0x396   :  { %v831_v48 = vrot.slane %v804_v41, %v3867_v29 }
 0x398   :  { %v853_v57 = vsel %vm706_vm3, %v831_v48, %v852_v52 }
 0x399   :  { %v807_v42 = vpop.permute.xlu1 %806 }
 0x39a   :  { %v835_v49 = vrot.slane %v807_v42, %v3867_v29  ;;  %v920_v42 = vld [vmem:[#allocation10] sm:$0xff] }
 0x39c   :  { %v854_v59 = vsel %vm708_vm4, %v835_v49, %v853_v57  ;;  %v922_v49 = vld [vmem:[#allocation10 + $0x10] sm:$0xff] }
 0x39d   :  { %v810_v43 = vpop.permute.xlu1 %809 }
 0x39e   :  { %v839_v50 = vrot.slane %v810_v43, %v3867_v29 }
 0x3a0   :  { %v855_v60 = vsel %vm710_vm5, %v839_v50, %v854_v59 }
 0x3a1   :  { %v813_v45 = vpop.permute.xlu1 %812 }
 0x3a2   :  { %v843_v56 = vrot.slane %v813_v45, %v3867_v29 }
 0x3a4   :  { %v856_v63 = vsel %vm712_vm6, %v843_v56, %v855_v60  ;;  %v926_v60 = vld [vmem:[#allocation10 + $0x30] sm:$0xff] }
 0x3a5   :  { %v816_v51 = vpop.permute.xlu1 %815 }
 0x3a6   :  { %v847_v58 = vrot.slane %v816_v51, %v3867_v29  ;;  %v924_v51 = vld [vmem:[#allocation10 + $0x20] sm:$0xff] }
 0x3a8   :  { %v857_v2 = vsel %vm714_vm7, %v847_v58, %v856_v63  ;;  %v925_v58 = vld [vmem:[#allocation10 + $0x28] sm:$0xff] }
 0x3a9   :  { %v819_v61 = vpop.permute.xlu1 %818 }
 0x3aa   :  { %v851_v1 = vrot.slane %v819_v61, %v3867_v29 }
 0x3ac   :  { %v858_v5 = vsel %vm716_vm8, %v851_v1, %v857_v2  ;;  %v927_v2 = vld [vmem:[#allocation10 + $0x38] sm:$0xff] }
 0x3ad   :  { %v860_v7 = vsel %vm719_vm9, %v858_v5, 0.0 }
 0x3ae   :  { %861 = vadd.xlane.f32.xlu1 %v860_v7 }
 0x3bd   :  { %v334_v10 = vpop.xlane.xlu0 %333 }
 0x3be   :  { %vm335_vm11 = vcmp.eq.f32.partialorder %v332_v40, %v334_v10 }
 0x3bf   :  { %v336_v14 = vsel %vm335_vm11, %v331_v12, inf  ;;  %v1570_v12 = vld [vmem:[%s4183_s11 + $0x8] sm:$0xff] }
 0x3c0   :  { %337 = vmin.xlane.f32.xlu0 %v336_v14  ;;  %v1824_v14 = vld [vmem:[#allocation26 + $0x8] sm:$0xff] }
 0x437   :  { %v862_v18 = vpop.xlane.xlu1 %861 }
 0x438   :  { %v871_v19 = vrot.slane %v862_v18, %v730_v53  ;;  %v867_v21 = vrot.slane %v862_v18, %v3840_v13  ;;  %v883_v22 = vrot.slane %v862_v18, %v742_v62  ;;  %v875_v23 = vrot.slane %v862_v18, %v734_v54 }
 0x439   :  { %v891_v26 = vrot.slane %v862_v18, %v750_v11  ;;  %v879_v28 = vrot.slane %v862_v18, %v738_v55  ;;  %v887_v13 = vrot.slane %v862_v18, %v746_v6  ;;  %v895_v53 = vrot.slane %v862_v18, %v754_v16  ;;  %v4043_v18 = vld [vmem:[#allocation7] sm:$0xff] }
 0x43a   :  { %3120 = vrcp.f32 %v871_v19  ;;  %v340_v54 = vcvt.f32.s32 %v334_v10 }
 0x43b   :  { %3122 = vrcp.f32 %v867_v21 }
 0x43c   :  { %3124 = vrcp.f32 %v883_v22  ;;  %v341_v6 = vshll.u32 %v340_v54, 16 }
 0x43d   :  { %3126 = vrcp.f32 %v875_v23 }
 0x43e   :  { %3128 = vrcp.f32 %v891_v26 }
 0x43f   :  { %3130 = vrcp.f32 %v879_v28 }
 0x440   :  { %3132 = vrcp.f32 %v887_v13 }
 0x441   :  { %3134 = vrcp.f32 %v895_v53 }
 0x447   :  { %v3121_v62 = vpop.eup %3120 }
 0x448   :  { %v3123_v33 = vpop.eup %3122  ;;  %v907_v4 = vmul.f32 %v3121_v62, %v3909_v24 }
 0x449   :  { %v3125_v11 = vpop.eup %3124  ;;  %v338_v37 = vpop.xlane.xlu0 %337  ;;  %v905_v55 = vmul.f32 %v3123_v33, %v3905_v20 }
 0x44a   :  { %v3127_v38 = vpop.eup %3126  ;;  %v339_v40 = vcvt.f32.s32 %v338_v37  ;;  %1010 = vperm.xlu0 %3086, %v907_v4   ;;  %v913_v16 = vmul.f32 %v3125_v11, %v3919_v34 }
 0x44b   :  { %930 = vperm.xlu1 %3087, %v905_v55   ;;  %v3129_v25 = vpop.eup %3128  ;;  %v909_v41 = vmul.f32 %v3127_v38, %v3913_v30 }
 0x44c   :  { %v342_v8 = vadd.s32 %v341_v6, %v339_v40  ;;  %v3131_v24 = vpop.eup %3130  ;;  %v917_v43 = vmul.f32 %v3129_v25, %v3927_v36 }
 0x44d   :  { %v911_v44 = vmul.f32 %v3131_v24, %v3916_v32  ;;  %v3133_v34 = vpop.eup %3132 }
 0x44e   :  { %1250 = vperm.xlu0 %3086, %v913_v16   ;;  %vm343_vm12 = vcmp.eq.s32.totalorder %v3863_v27, %v342_v8  ;;  %v915_v27 = vmul.f32 %v3133_v34, %v3923_v35  ;;  %v3135_v30 = vpop.eup %3134 }
 0x44f   :  { %1090 = vperm.xlu1 %3087, %v909_v41   ;;  %v2808_v20 = vsel %vm343_vm12, 1.0, %v3595_v0  ;;  %v919_v45 = vmul.f32 %v3135_v30, %v3931_v39 }
 0x450   :  { %2908 = vmatmul.mubr.msk.f32.vlgmr.msra.gmra.mxu0 %vm320_vm1, %v2808_v20 }
 0x451   :  { %2918 = vmatpush3.msra.mxu0 %v920_v42  ;;  %2919 = vmatprep.mubr.msk.f32.mxu0 %vm3596_vm0, %v3595_v0 }
 0x452   :  { %1410 = vperm.xlu0 %3086, %v917_v43   ;;  %2927 = vmatprep.subr.mxu0 %v3595_v0 }
 0x453   :  { %1170 = vperm.xlu1 %3087, %v911_v44  }
 0x456   :  { %2273 = vrot.lane.b32.xlu0 %v4043_v18, %s3599_s4 }
 0x457   :  { %1330 = vperm.xlu1 %3087, %v915_v27   ;;  %v1739_v27 = vld [vmem:[#allocation17 + $0x8] sm:$0xff] }
 0x45b   :  { %1490 = vperm.xlu1 %3087, %v919_v45   ;;  %v1966_v45 = vld [vmem:[#allocation28 + $0x8] sm:$0xff] }
 0x4c5   :  { %v1011_v46 = vpop.permute.xlu0 %1010 }
 0x4c6   :  { %v1015_v36 = vrot.slane %v1011_v46, %v3867_v29  ;;  %v931_v32 = vpop.permute.xlu1 %930  ;;  %v1738_v46 = vld [vmem:[#allocation17] sm:$0xff] }
 0x4c7   :  { %v935_v48 = vrot.slane %v931_v32, %v3867_v29  ;;  %v1822_v32 = vld [vmem:[#allocation25] sm:$0xff] }
 0x4c8   :  { %2925 = vmatmul.mubr.msk.f32.vlgmr.msra.gmra.mxu1 %vm719_vm9, %v1015_v36  ;;  %v319_v36 = vld [vmem:[#allocation8] sm:$0xff] }
 0x4c9   :  { %2920 = vmatmul.mubr.msk.f32.vlgmr.msra.gmra.mxu0 %vm719_vm9, %v935_v48  ;;  %2933 = vmatpush3.msra.mxu1 %v923_v47  ;;  %v1251_v50 = vpop.permute.xlu0 %1250  ;;  %v1965_v47 = vld [vmem:[#allocation28] sm:$0xff]  ;;  %v2039_v48 = vld [vmem:[%s4186_s14 + $0x8] sm:$0xff] }
 0x4ca   :  { %v1091_v35 = vpop.permute.xlu1 %1090  ;;  %2928 = vmatpush3.msra.mxu0 %v922_v49  ;;  %2929 = vmatprep.mubr.msk.f32.mxu0 %vm3596_vm0, %v3595_v0  ;;  %v1255_v56 = vrot.slane %v1251_v50, %v3867_v29  ;;  %v2112_v49 = vld [vmem:[#allocation20 + $0x8] sm:$0xff] }
 0x4cb   :  { %v1095_v39 = vrot.slane %v1091_v35, %v3867_v29  ;;  %2937 = vmatprep.subr.mxu0 %v3595_v0  ;;  %2934 = vmatprep.mubr.msk.f32.mxu1 %vm3596_vm0, %v3595_v0  ;;  %v2038_v50 = vld [vmem:[%s4186_s14] sm:$0xff]  ;;  %s3600_s14 = smov 112  }
 0x4cc   :  { %2942 = vmatprep.subr.mxu1 %v3595_v0  ;;  %v2111_v35 = vld [vmem:[#allocation20] sm:$0xff] }
 0x4cd   :  { %2930 = vmatmul.mubr.msk.f32.vlgmr.msra.gmra.mxu0 %vm719_vm9, %v1095_v39  ;;  %v1411_v59 = vpop.permute.xlu0 %1410  ;;  %v4087_v39 = vld [vmem:[#allocation22 + $0x8] sm:$0xff] }
 0x4ce   :  { %v1171_v52 = vpop.permute.xlu1 %1170  ;;  %2938 = vmatpush3.msra.mxu0 %v924_v51  ;;  %2939 = vmatprep.mubr.msk.f32.mxu0 %vm3596_vm0, %v3595_v0  ;;  %v1415_v63 = vrot.slane %v1411_v59, %v3867_v29  ;;  %v4094_v51 = vld [vmem:[#allocation22] sm:$0xff] }
 0x4cf   :  { %v1175_v57 = vrot.slane %v1171_v52, %v3867_v29  ;;  %2947 = vmatprep.subr.mxu0 %v3595_v0 }
 0x4d1   :  { %2935 = vmatmul.mubr.msk.f32.vlgmr.msra.gmra.mxu1 %vm719_vm9, %v1175_v57  ;;  %2940 = vmatmul.mubr.msk.f32.vlgmr.msra.gmra.mxu0 %vm719_vm9, %v1255_v56 }
 0x4d2   :  { %2943 = vmatpush3.msra.mxu1 %v925_v58  ;;  %v1331_v61 = vpop.permute.xlu1 %1330  ;;  %2944 = vmatprep.mubr.msk.f32.mxu1 %vm3596_vm0, %v3595_v0 }
 0x4d3   :  { %v1335_v1 = vrot.slane %v1331_v61, %v3867_v29  ;;  %2948 = vmatpush3.msra.mxu0 %v926_v60  ;;  %2949 = vmatprep.mubr.msk.f32.mxu0 %vm3596_vm0, %v3595_v0 }
 0x4d4   :  { %2952 = vmatprep.subr.mxu1 %v3595_v0  ;;  %2957 = vmatprep.subr.mxu0 %v3595_v0 }
 0x4d5   :  { %2945 = vmatmul.mubr.msk.f32.vlgmr.msra.gmra.mxu1 %vm719_vm9, %v1335_v1  ;;  %2950 = vmatmul.mubr.msk.f32.vlgmr.msra.gmra.mxu0 %vm719_vm9, %v1415_v63 }
 0x4d6   :  { %2953 = vmatpush3.msra.mxu1 %v927_v2  ;;  %v1491_v5 = vpop.permute.xlu1 %1490  ;;  %2954 = vmatprep.mubr.msk.f32.mxu1 %vm3596_vm0, %v3595_v0 }
 0x4d7   :  { %v1495_v7 = vrot.slane %v1491_v5, %v3867_v29  ;;  %2964 = vmatprep.subr.mxu1 %v3595_v0  ;;  %2961 = vmatprep.mubr.msk.f32.mxu0 %vm3596_vm0, %v3595_v0 }
 0x4d8   :  { %2958 = vmatpush3.msra.mxu0 %v1570_v12 }
 0x4d9   :  { %2955 = vmatmul.mubr.msk.f32.vlgmr.msra.gmra.mxu1 %vm719_vm9, %v1495_v7  ;;  %2959 = vmatprep.subr.mxu0 %v3595_v0 }
 0x4da   :  { %2965 = vmatpush3.msra.mxu1 %v1568_v9  ;;  %2966 = vmatprep.mubr.msk.f32.mxu1 %vm3596_vm0, %v3595_v0 }
 0x4db   :  { %2976 = vmatprep.subr.mxu1 %v3595_v0  ;;  %2960 = vmatpush3.msra.mxu0 %v1569_v15 }
 0x4dc   :  { %2969 = vmatprep.subr.mxu0 %v3595_v0 }
 0x510   :  { %v4027_v10 = vpop.f32.mrf.mxu0 }
 0x511   :  { %2967 = vmatmul.mubr.msk.f32.vlgmr.msra.gmra.mxu1 %vm719_vm9, %v4027_v10 }
 0x512   :  { %v2909_v29 = vpop.f32.mrf.mxu0  ;;  %2980 = vmatprep.mubr.msk.f32.mxu1 %vm3596_vm0, %v3595_v0  ;;  %2977 = vmatpush3.msra.mxu1 %v1824_v14 }
 0x513   :  { %2978 = vmatprep.subr.mxu1 %v3595_v0  ;;  %v2824_v29 = vld [vmem:[#allocation19] ss:$0 sm:$0xff] }
 0x514   :  { %2979 = vmatpush3.msra.mxu1 %v1823_v17 }
 0x515   :  { %2988 = vmatprep.subr.mxu1 %v3595_v0 }
 0x588   :  { %v1084_v19 = vpop.f32.mrf.mxu1 }
 0x589   :  { %v1004_v21 = vpop.f32.mrf.mxu0  ;;  %v1579_v28 = vrot.slane %v1084_v19, 7 }
 0x58a   :  { %v2926_v22 = vpop.f32.mrf.mxu1 }
 0x58b   :  { %v2921_v23 = vpop.f32.mrf.mxu0  ;;  %v1580_v31 = vsel %vm704_vm2, %v1579_v28, %v1004_v21 }
 0x58d   :  { %v1164_v26 = vpop.f32.mrf.mxu0 }
 0x58e   :  { %v1581_v13 = vrot.slane %v1164_v26, 6 }
 0x58f   :  { %v2931_v53 = vpop.f32.mrf.mxu0 }
 0x590   :  { %v1582_v4 = vsel %vm706_vm3, %v1581_v13, %v1580_v31 }
 0x591   :  { %v1244_v54 = vpop.f32.mrf.mxu1  ;;  %v1324_v62 = vpop.f32.mrf.mxu0 }
 0x592   :  { %v1583_v33 = vrot.slane %v1244_v54, 5  ;;  %v1585_v11 = vrot.slane %v1324_v62, 4  ;;  %v4117_v54 = vld [vmem:[#allocation23] ss:$0 sm:$0xff] }
 0x593   :  { %v2936_v37 = vpop.f32.mrf.mxu1  ;;  %v2941_v55 = vpop.f32.mrf.mxu0 }
 0x594   :  { %v1584_v38 = vsel %vm708_vm4, %v1583_v33, %v1582_v4  ;;  %v2274_v55 = vpop.permute.xlu0 %2273 }
 0x595   :  { %v1404_v6 = vpop.f32.mrf.mxu1  ;;  %v1484_v40 = vpop.f32.mrf.mxu0  ;;  %v1586_v16 = vsel %vm710_vm5, %v1585_v11, %v1584_v38 }
 0x596   :  { %v1587_v8 = vrot.slane %v1404_v6, 3  ;;  %v1589_v25 = vrot.slane %v1484_v40, 2 }
 0x597   :  { %v2946_v41 = vpop.f32.mrf.mxu1  ;;  %v2951_v24 = vpop.f32.mrf.mxu0 }
 0x598   :  { %v1588_v42 = vsel %vm712_vm6, %v1587_v8, %v1586_v16 }
 0x599   :  { %v1564_v20 = vpop.f32.mrf.mxu1  ;;  %v1590_v44 = vsel %vm714_vm7, %v1589_v25, %v1588_v42  ;;  %v2540_v42 = vld [vmem:[%s4194_s22 + $0x8] sm:$0xff] }
 0x59a   :  { %v1591_v43 = vrot.slane %v1564_v20, 1 }
 0x59b   :  { %v2956_v34 = vpop.f32.mrf.mxu1 }
 0x59c   :  { %v4054_v30 = vsel %vm716_vm8, %v1591_v43, %v1590_v44  ;;  %v2539_v43 = vld [vmem:[%s4194_s22] sm:$0xff]  ;;  %v2686_v44 = vld [vmem:[#allocation31] sm:$0xff]  ;;  %s3602_s22 = smov 48  }
 0x59d   :  { %2962 = vmatmul.mubr.msk.f32.vlgmr.msra.gmra.mxu0 %vm320_vm1, %v4054_v30  ;;  %2981 = vmatmul.mubr.msk.f32.vlgmr.msra.gmra.mxu1 %vm320_vm1, %v4054_v30 }
 0x59e   :  { %2970 = vmatpush3.msra.mxu0 %v1739_v27  ;;  %2973 = vmatprep.mubr.msk.f32.mxu0 %vm3596_vm0, %v3595_v0 }
 0x59f   :  { %2971 = vmatprep.subr.mxu0 %v3595_v0  ;;  %2989 = vmatpush3.msra.mxu1 %v1966_v45 }
 0x5a0   :  { %2972 = vmatpush3.msra.mxu0 %v1738_v46  ;;  %2990 = vmatprep.subr.mxu1 %v3595_v0 }
 0x5a1   :  { %2983 = vmatprep.subr.mxu0 %v3595_v0  ;;  %2974 = vmatmul.mubr.msk.f32.vlgmr.msra.gmra.mxu0 %vm320_vm1, %v319_v36 }
 0x5a2   :  { %2984 = vmatpush3.msra.mxu0 %v1822_v32  ;;  %2985 = vmatprep.mubr.msk.f32.mxu0 %vm3596_vm0, %v3595_v0 }
 0x5a3   :  { %2991 = vmatpush3.msra.mxu1 %v1965_v47  ;;  %2992 = vmatprep.mubr.msk.f32.mxu1 %vm3596_vm0, %v3595_v0 }
 0x5a4   :  { %2995 = vmatprep.subr.mxu0 %v3595_v0  ;;  %2993 = vmatmul.mubr.msk.f32.vlgmr.msra.gmra.mxu1 %vm320_vm1, %v319_v36 }
 0x5a5   :  { %2986 = vmatmul.mubr.msk.f32.vlgmr.msra.gmra.mxu0 %vm719_vm9, %v4027_v10  ;;  %3002 = vmatprep.subr.mxu1 %v3595_v0 }
 0x5a6   :  { %2996 = vmatpush3.msra.mxu0 %v2039_v48  ;;  %3003 = vmatpush3.msra.mxu1 %v2112_v49 }
 0x5a7   :  { %2997 = vmatprep.subr.mxu0 %v3595_v0  ;;  %3004 = vmatprep.subr.mxu1 %v3595_v0 }
 0x5a8   :  { %2998 = vmatpush3.msra.mxu0 %v2038_v50  ;;  %2999 = vmatprep.mubr.msk.f32.mxu0 %vm3596_vm0, %v3595_v0 }
 0x5a9   :  { %3005 = vmatpush3.msra.mxu1 %v2111_v35  ;;  %3006 = vmatprep.mubr.msk.f32.mxu1 %vm3596_vm0, %v3595_v0 }
 0x5aa   :  { %3000 = vmatmul.mubr.msk.f32.vlgmr.msra.gmra.mxu0 %vm320_vm1, %v3827_v3  ;;  %3007 = vmatmul.mubr.msk.f32.vlgmr.msra.gmra.mxu1 %vm320_vm1, %v4043_v18 }
 0x5ab   :  { %3009 = vmatprep.subr.mxu0 %v3595_v0  ;;  %3013 = vmatprep.mubr.msk.f32.mxu0 %vm3596_vm0, %v3595_v0 }
 0x5ac   :  { %3010 = vmatpush3.msra.mxu0 %v4087_v39  ;;  %3016 = vmatprep.subr.mxu1 %v3595_v0 }
 0x5ad   :  { %3011 = vmatprep.subr.mxu0 %v3595_v0  ;;  %3017 = vmatpush3.msra.mxu1 %v2039_v48 }
 0x5ae   :  { %3012 = vmatpush3.msra.mxu0 %v4094_v51  ;;  %3018 = vmatprep.subr.mxu1 %v3595_v0 }
 0x5af   :  { %3014 = vmatmul.mubr.msk.f32.vlgmr.msra.gmra.mxu0 %vm320_vm1, %v3827_v3  ;;  %3023 = vmatprep.subr.mxu0 %v3595_v0 }
 0x5b0   :  { %3024 = vmatpush3.msra.mxu0 %v2112_v49  ;;  %3027 = vmatprep.mubr.msk.f32.mxu0 %vm3596_vm0, %v3595_v0 }
 0x5b1   :  { %3025 = vmatprep.subr.mxu0 %v3595_v0  ;;  %3019 = vmatpush3.msra.mxu1 %v2038_v50 }
 0x5b2   :  { %3026 = vmatpush3.msra.mxu0 %v2111_v35  ;;  %3020 = vmatprep.mubr.msk.f32.mxu1 %vm3596_vm0, %v3595_v0 }
 0x5b3   :  { %3037 = vmatprep.subr.mxu0 %v3595_v0  ;;  %3030 = vmatprep.subr.mxu1 %v3595_v0 }
 0x5d1   :  { %v1734_v52 = vpop.f32.mrf.mxu1 }
 0x5d3   :  { %v2968_v56 = vpop.f32.mrf.mxu1 }
 0x65d   :  { %v1661_v3 = vpop.f32.mrf.mxu0  ;;  %v1891_v57 = vpop.f32.mrf.mxu1 }
 0x65e   :  { %v1735_v61 = vadd.f32 %v1734_v52, %v1661_v3 }
 0x65f   :  { %v2963_v58 = vpop.f32.mrf.mxu0  ;;  %v2982_v59 = vpop.f32.mrf.mxu1 }
 0x661   :  { %v1809_v60 = vpop.f32.mrf.mxu0 }
 0x662   :  { %v1813_v2 = vadd.f32 %v1809_v60, %v1735_v61 }
 0x663   :  { %v2975_v63 = vpop.f32.mrf.mxu0 }
 0x664   :  { %v2033_v1 = vpop.f32.mrf.mxu1  ;;  %v4113_v15 = vadd.f32 %v2824_v29, %v1813_v2  ;;  %v2538_v2 = vld [vmem:[#allocation29 + $0x8] sm:$0xff] }
 0x665   :  { %v1961_v5 = vpop.f32.mrf.mxu0 }
 0x666   :  { %v1962_v7 = vadd.f32 %v1961_v5, %v1891_v57  ;;  %v2994_v9 = vpop.f32.mrf.mxu1  ;;  %v2537_v5 = vld [vmem:[#allocation29] sm:$0xff] }
 0x667   :  { %v2987_v12 = vpop.f32.mrf.mxu0 }
 0x668   :  { %v2037_v14 = vadd.f32 %v2033_v1, %v1962_v7 }
 0x66a   :  { %v2106_v17 = vpop.f32.mrf.mxu0  ;;  %v2182_v18 = vpop.f32.mrf.mxu1  ;;  %2285 = vrot.lane.b32.xlu0 %v2037_v14, %s3599_s4 }
 0x66b   :  { %v2110_v19 = vadd.f32 %v2106_v17, %v4113_v15 }
 0x66c   :  { %v3001_v21 = vpop.f32.mrf.mxu0  ;;  %v3008_v22 = vpop.f32.mrf.mxu1 }
 0x66d   :  { %v2186_v23 = vadd.f32 %v2182_v18, %v2110_v19  ;;  %v2838_v18 = vld [vmem:[%s4196_s24] ss:$0 sm:$0xff] }
 0x66f   :  { %v2187_v26 = vsub.f32 0.0, %v2186_v23  ;;  %v2268_v28 = vpop.f32.mrf.mxu0 }
 0x670   :  { %v2269_v62 = vadd.f32 %v4117_v54, %v2268_v28 }
 0x671   :  { %v2188_v13 = vmul.f32 1.442695, %v2187_v26  ;;  %v3015_v53 = vpop.f32.mrf.mxu0 }
 0x673   :  { %3136 = vpow2.f32 %v2188_v13 }
 0x674   :  { %3138 = vtanh.f32 %v2269_v62 }
 0x680   :  { %v3137_v31 = vpop.eup %3136 }
 0x681   :  { %v2190_v33 = vadd.f32 1.0, %v3137_v31  ;;  %v3139_v4 = vpop.eup %3138 }
 0x683   :  { %3140 = vrcp.f32 %v2190_v33 }
 0x690   :  { %v3141_v11 = vpop.eup %3140 }
 0x691   :  { %v2277_v37 = vmul.f32 %v3141_v11, %v3139_v4  ;;  %v2276_v38 = vmul.f32 %v3141_v11, %v2274_v55 }
 0x693   :  { %2279 = vrot.lane.b32.xlu1 %v2277_v37, %s3599_s4 }
 0x6dc   :  { %v4121_v16 = vpop.permute.xlu0 %2285 }
 0x705   :  { %v2280_v6 = vpop.permute.xlu1 %2279 }
 0x706   :  { %v2282_v40 = vadd.f32 %v2280_v6, %v2276_v38 }
 0x708   :  { %3142 = vtanh.f32 %v2282_v40 }
 0x715   :  { %v3143_v8 = vpop.eup %3142 }
 0x716   :  { %v2288_v25 = vadd.f32 %v3143_v8, %v4121_v16 }
 0x718   :  { %2290 = vrot.lane.b32.xlu1 %v2288_v25, %s3599_s4 }
 0x71c   :  { %2371 = vrot.lane.b32.xlu1 %v2282_v40, %s3600_s14 }
 0x78a   :  { %v2291_v41 = vpop.permute.xlu1 %2290 }
 0x78b   :  { %v2293_v24 = vmul.f32 %v3141_v11, %v2291_v41 }
 0x78d   :  { %2295 = vrot.lane.b32.xlu0 %v2293_v24, %s3601_s9 }
 0x78e   :  { %v2372_v20 = vpop.permute.xlu1 %2371 }
 0x78f   :  { %3028 = vmatmul.mubr.msk.f32.vlgmr.msra.gmra.mxu0 %vm320_vm1, %v2372_v20 }
 0x790   :  { %3038 = vmatpush3.msra.mxu0 %v2540_v42  ;;  %3041 = vmatprep.mubr.msk.f32.mxu0 %vm3596_vm0, %v3595_v0 }
 0x791   :  { %3039 = vmatprep.subr.mxu0 %v3595_v0 }
 0x792   :  { %3040 = vmatpush3.msra.mxu0 %v2539_v43 }
 0x793   :  { %3042 = vmatmul.mubr.msk.f32.vlgmr.msra.gmra.mxu0 %vm320_vm1, %v4054_v30  ;;  %3051 = vmatprep.subr.mxu0 %v3595_v0 }
 0x794   :  { %3052 = vmatpush3.msra.mxu0 %v2686_v44  ;;  %3053 = vmatprep.mubr.msk.f32.mxu0 %vm3596_vm0, %v3595_v0 }
 0x797   :  { %3054 = vmatmul.mubr.msk.f32.vlgmr.msra.gmra.mxu0 %vm719_vm9, %v4027_v10 }
 0x7ff   :  { %v2296_v34 = vpop.permute.xlu0 %2295 }
 0x800   :  { %3021 = vmatmul.mubr.msk.f32.vlgmr.msra.gmra.mxu1 %vm320_vm1, %v2296_v34 }
 0x801   :  { %3031 = vmatpush3.msra.mxu1 %v4087_v39  ;;  %3034 = vmatprep.mubr.msk.f32.mxu1 %vm3596_vm0, %v3595_v0 }
 0x802   :  { %3032 = vmatprep.subr.mxu1 %v3595_v0 }
 0x803   :  { %3033 = vmatpush3.msra.mxu1 %v4094_v51 }
 0x804   :  { %3035 = vmatmul.mubr.msk.f32.vlgmr.msra.gmra.mxu1 %vm320_vm1, %v2296_v34  ;;  %3044 = vmatprep.subr.mxu1 %v3595_v0 }
 0x805   :  { %3048 = vmatprep.mubr.msk.f32.mxu1 %vm3596_vm0, %v3595_v0  ;;  %3045 = vmatpush3.msra.mxu1 %v2538_v2 }
 0x806   :  { %3046 = vmatprep.subr.mxu1 %v3595_v0 }
 0x807   :  { %3047 = vmatpush3.msra.mxu1 %v2537_v5 }
 0x84f   :  { %v2441_v10 = vpop.f32.mrf.mxu0 }
 0x851   :  { %v3029_v27 = vpop.f32.mrf.mxu0 }
 0x853   :  { %v2607_v45 = vpop.f32.mrf.mxu0 }
 0x855   :  { %v3043_v46 = vpop.f32.mrf.mxu0 }
 0x857   :  { %v2753_v36 = vpop.f32.mrf.mxu0 }
 0x859   :  { %v3055_v32 = vpop.f32.mrf.mxu0 }
 0x8c0   :  { %v2365_v47 = vpop.f32.mrf.mxu1 }
 0x8c1   :  { %v2369_v48 = vadd.f32 %v2365_v47, %v4113_v15 }
 0x8c2   :  { %v3022_v49 = vpop.f32.mrf.mxu1 }
 0x8c3   :  { %v2445_v50 = vadd.f32 %v2441_v10, %v2369_v48 }
 0x8c4   :  { %v2518_v35 = vpop.f32.mrf.mxu1 }
 0x8c5   :  { %v2446_v39 = vsub.f32 0.0, %v2445_v50  ;;  %v2519_v56 = vadd.f32 %v4117_v54, %v2518_v35 }
 0x8c6   :  { %v3036_v51 = vpop.f32.mrf.mxu1 }
 0x8c7   :  { %v2447_v52 = vmul.f32 1.442695, %v2446_v39 }
 0x8c9   :  { %3144 = vpow2.f32 %v2447_v52 }
 0x8ca   :  { %3146 = vtanh.f32 %v2519_v56 }
 0x8d6   :  { %v3145_v3 = vpop.eup %3144 }
 0x8d7   :  { %v2449_v57 = vadd.f32 1.0, %v3145_v3  ;;  %v3147_v58 = vpop.eup %3146 }
 0x8d9   :  { %3148 = vrcp.f32 %v2449_v57 }
 0x8e6   :  { %v3149_v59 = vpop.eup %3148 }
 0x8e7   :  { %v2524_v60 = vmul.f32 %v3149_v59, %v3147_v58  ;;  %v2523_v61 = vmul.f32 %v3149_v59, %v2282_v40 }
 0x8e9   :  { %2526 = vrot.lane.b32.xlu0 %v2524_v60, %s3599_s4 }
 0x95b   :  { %v2527_v63 = vpop.permute.xlu0 %2526 }
 0x95c   :  { %v2529_v1 = vadd.f32 %v2527_v63, %v2523_v61 }
 0x95e   :  { %3150 = vtanh.f32 %v2529_v1 }
 0x96b   :  { %v3151_v7 = vpop.eup %3150 }
 0x96c   :  { %v2531_v9 = vadd.f32 %v3151_v7, %v4121_v16 }
 0x96e   :  { %2533 = vrot.lane.b32.xlu1 %v2531_v9, %s3599_s4 }
 0x9e0   :  { %v2534_v29 = vpop.permute.xlu1 %2533 }
 0x9e1   :  { %v2536_v12 = vmul.f32 %v3149_v59, %v2534_v29 }
 0x9e3   :  { %2766 = vrot.lane.b32.xlu1 %v2536_v12, %s3600_s14  ;;  %2612 = vrot.lane.b32.xlu0 %v2536_v12, %s3601_s9 }
 0x9e7   :  { %2773 = vrot.lane.b32.xlu1 %v4054_v30, %s3602_s22  ;;  %2770 = vrot.lane.b32.xlu0 %v2529_v1, %s3599_s4 }
 0xa55   :  { %v2613_v14 = vpop.permute.xlu0 %2612  ;;  %v2767_v17 = vpop.permute.xlu1 %2766 }
 0xa56   :  { %3049 = vmatmul.mubr.msk.f32.vlgmr.msra.gmra.mxu1 %vm320_vm1, %v2613_v14 }
 0xa59   :  { %v2771_v30 = vpop.permute.xlu0 %2770  ;;  %v2774_v26 = vpop.permute.xlu1 %2773 }
 0xb16   :  { %v2682_v0 = vpop.f32.mrf.mxu1 }
 0xb17   :  { %v2683_v15 = vadd.f32 %v2682_v0, %v2607_v45 }
 0xb18   :  { %v3050_v19 = vpop.f32.mrf.mxu1 }
 0xb19   :  { %v2757_v21 = vadd.f32 %v2753_v36, %v2683_v15 }
 0xb1b   :  { %v2765_v22 = vadd.f32 %v2838_v18, %v2757_v21 }
 0xb1d   :  { %v2776_v23 = vsel %vm320_vm1, %v2765_v22, %v2767_v17 }
 0xb1e   :  { %v2778_v28 = vsel %vm2777_vm13, %v2776_v23, %v2771_v30 }
 0xb1f   :  { %v2780_v13 = vsel %vm2779_vm14, %v2778_v28, %v2774_v26 }
 0xb20   :  { %v2782_v53 = vsel %vm2781_vm15, %v2780_v13, 0.0 }
 0xb21   :  { %2783 = vst [vmem:[#allocation32] sm:$0xff] %v2782_v53 }
 0xb22   :  { %3543 = shalt.err (!%p3540_p1)
}
 0xb23   :  { %s4221_s2 = sld [smem:[#allocation54_spill]] }
 0xb29   :  { %2793 = dma.vmem_to_hbm [thread:$0]  %s2791_s25, 128, %s4221_s2, [#allocation4]  }
 0xb2a   :  { %3572 = dma.done.wait [#allocation4], 128  }
 0xb2b   :  { %3573 = vsyncadd [#allocation4], 4294967168 }
 0xb2c   :  { %2797 = vsyncpa [#allocation3], 1 }
 0xb2d   :  { %2798 = vsyncpa [#allocation6], 1 }
 0xb2e   :  { %2799 = vsyncpa [#allocation9], 1 }
 0xb2f   :  { %2800 = vsyncpa [#allocation12], 1 }
 0xb30   :  { %2801 = vsyncpa [#allocation15], 1 }
 0xb31   :  { %2802 = vsyncpa [#allocation18], 1 }
 0xb32   :  { %2803 = vsyncpa [#allocation21], 1 }
 0xb33   :  { %2804 = vsyncpa [#allocation24], 1 }
 0xb34   :  { %2805 = vsyncpa [#allocation27], 1 }
 0xb35   :  { %2806 = vsyncpa [#allocation30], 1 }
 0xb36   :  { %2807 = vsyncpa [#allocation4], 1 }

</bundles_post_ra>
